<compile_context>
chip_gen: v7x
topology: tpu7x:2x2x1
jax: 0.10.0
libtpu: 0.0.40
codegen_flags: <defaults>
</compile_context>

<pallas_src>
import functools

import jax
import jax.numpy as jnp
import numpy as np
from jax.experimental import pallas as pl
from jax.experimental.pallas import tpu as pltpu

BLOCK = 128                    # block_size in the PyTorch source
FP8_MAX = 448.0                # max magnitude of float8_e4m3fn
VMEM_LIMIT = 48 * 1024 * 1024  # > v5e 16 MiB default scoped, < v7x 64 MiB physical


# ----------------------------------------------------------------------------
# Shared kernel pieces
# ----------------------------------------------------------------------------
def _contract_nt(a, b):
    """a (m, k) contracted with b (n, k) -> (m, n), f32 MXU accumulation."""
    return jax.lax.dot_general(
        a, b, dimension_numbers=(((1,), (1,)), ((), ())),
        preferred_element_type=jnp.float32)


def _dequant_weight_tile(w_ref, scale_ref, j, k, n_sub, k_sub, kb):
    """Dequantize the full (tn, tk) fp8 weight tile once per grid step.

    Per 128x128 block: fp8 -> bf16 (exact), multiply by the block's f32 scale
    (promotes to f32: v5e-friendly), cast to bf16.  Blocks are assembled with
    128-aligned concatenations (no relayout).  `scale_ref` is the flat
    (N/128 * K/128,) f32 SMEM array; (j, k) are the N / K grid positions.
    """
    rows = []
    for jj in range(n_sub):
        cols = []
        for kk in range(k_sub):
            sc = scale_ref[(j * n_sub + jj) * kb + (k * k_sub + kk)]
            blk = w_ref[jj * BLOCK:(jj + 1) * BLOCK,
                        kk * BLOCK:(kk + 1) * BLOCK].astype(jnp.bfloat16)
            cols.append((blk * sc).astype(jnp.bfloat16))   # bf16 * f32 -> f32 mul
        rows.append(cols[0] if k_sub == 1 else jnp.concatenate(cols, axis=1))
    return rows[0] if n_sub == 1 else jnp.concatenate(rows, axis=0)


# ----------------------------------------------------------------------------
# Kernel 1: blockwise-dequant GEMM + LoRA epilogue  (used for w2)
# ----------------------------------------------------------------------------
def _linear_lora_kernel(scale_ref, x_ref, w_ref, down_ref, up_ref, o_ref,
                        acc_ref, t_ref, *, lora_scale, n_sub, k_sub, kb,
                        use_lora):
    j = pl.program_id(1)
    k = pl.program_id(2)

    @pl.when(k == 0)
    def _():
        acc_ref[...] = jnp.zeros_like(acc_ref)
        if use_lora:
            t_ref[...] = jnp.zeros_like(t_ref)

    x = x_ref[...]
    if use_lora:
        t_ref[...] += _contract_nt(x, down_ref[...])          # (tm, r)
    wd = _dequant_weight_tile(w_ref, scale_ref, j, k, n_sub, k_sub, kb)
    acc_ref[...] += _contract_nt(x, wd)                        # one update / step

    @pl.when(k == pl.num_programs(2) - 1)
    def _():
        out = acc_ref[...]
        if use_lora:
            lora = _contract_nt(t_ref[...].astype(jnp.bfloat16), up_ref[...])
            out = out + lora_scale * lora
        o_ref[...] = out.astype(o_ref.dtype)


# ----------------------------------------------------------------------------
# Kernel 2: fused w1/w3 (gate+up) GEMMs + LoRA epilogues + silu(h1)*h3
# ----------------------------------------------------------------------------
def _gate_up_silu_kernel(s1_ref, s3_ref, x_ref, w1_ref, w3_ref, dcat_ref,
                         u1p_ref, u3p_ref, o_ref,
                         acc1_ref, acc3_ref, t_ref,
                         *, lora_scale, n_sub, k_sub, kb, use_lora):
    j = pl.program_id(1)
    k = pl.program_id(2)

    @pl.when(k == 0)
    def _():
        acc1_ref[...] = jnp.zeros_like(acc1_ref)
        acc3_ref[...] = jnp.zeros_like(acc3_ref)
        if use_lora:
            t_ref[...] = jnp.zeros_like(t_ref)

    x = x_ref[...]
    if use_lora:
        # One rank-2r down-projection dot for both LoRA branches.
        t_ref[...] += _contract_nt(x, dcat_ref[...])           # (tm, 2r)

    w1d = _dequant_weight_tile(w1_ref, s1_ref, j, k, n_sub, k_sub, kb)
    acc1_ref[...] += _contract_nt(x, w1d)
    w3d = _dequant_weight_tile(w3_ref, s3_ref, j, k, n_sub, k_sub, kb)
    acc3_ref[...] += _contract_nt(x, w3d)

    @pl.when(k == pl.num_programs(2) - 1)
    def _():
        h1 = acc1_ref[...]
        h3 = acc3_ref[...]
        if use_lora:
            t_bf = t_ref[...].astype(jnp.bfloat16)
            h1 = h1 + lora_scale * _contract_nt(t_bf, u1p_ref[...])
            h3 = h3 + lora_scale * _contract_nt(t_bf, u3p_ref[...])
        o_ref[...] = (h1 * jax.nn.sigmoid(h1) * h3).astype(o_ref.dtype)


# ----------------------------------------------------------------------------
# Tiling
# ----------------------------------------------------------------------------
def _pick_tile(dim, cap, quantum):
    if dim <= cap:
        return dim
    t = (cap // quantum) * quantum
    while t >= quantum:
        if dim % t == 0:
            return t
        t -= quantum
    return dim


def _pick_tiles(M, N, K):
    tm = _pick_tile(M, 512, 16)       # 16: bf16 sublane packing friendly
    tn = _pick_tile(N, 512, BLOCK)
    tk = _pick_tile(K, 512, BLOCK)    # full-depth contraction for 256x256 MXU
    # v7x megacore: keep a "parallel" grid axis of extent >= 2 when M fits one tile.
    if M // tm == 1 and N // tn == 1 and tn % (2 * BLOCK) == 0:
        tn //= 2
    assert M % tm == 0 and N % tn == 0 and K % tk == 0, \
        "shapes must tile evenly (no remainder/masking path implemented)"
    assert tm % 8 == 0 and tn % BLOCK == 0 and tk % BLOCK == 0
    return tm, tn, tk


# ----------------------------------------------------------------------------
# Wrappers
# ----------------------------------------------------------------------------
def fused_linear_lora(x2d, w_fp8, scale, lora_down, lora_up, lora_scale,
                      use_lora=True, *, out_dtype=jnp.bfloat16):
    """y = x @ dequant(w_fp8, scale)^T + lora_scale * (x @ down^T) @ up^T."""
    M, K = x2d.shape
    N = w_fp8.shape[0]
    r = lora_down.shape[0]
    tm, tn, tk = _pick_tiles(M, N, K)
    n_sub, k_sub, kb = tn // BLOCK, tk // BLOCK, K // BLOCK
    grid = (M // tm, N // tn, K // tk)

    kernel = functools.partial(
        _linear_lora_kernel, lora_scale=float(lora_scale),
        n_sub=n_sub, k_sub=k_sub, kb=kb, use_lora=use_lora)
    # TODO(synk): at very large N,K the flat scale array's SMEM padding should
    #             be checked; fall back to a VMEM (j,k)-blocked scale input.
    return pl.pallas_call(
        kernel,
        out_shape=jax.ShapeDtypeStruct((M, N), out_dtype),
        grid_spec=pltpu.PrefetchScalarGridSpec(
            num_scalar_prefetch=1,                               # flat scales -> SMEM
            grid=grid,
            in_specs=[
                pl.BlockSpec((tm, tk), lambda i, j, k, s: (i, k)),   # x  bf16
                pl.BlockSpec((tn, tk), lambda i, j, k, s: (j, k)),   # W  fp8
                pl.BlockSpec((r, tk), lambda i, j, k, s: (0, k)),    # lora_down
                pl.BlockSpec((tn, r), lambda i, j, k, s: (j, 0)),    # lora_up
            ],
            out_specs=pl.BlockSpec((tm, tn), lambda i, j, k, s: (i, j)),
            scratch_shapes=[pltpu.VMEM((tm, tn), jnp.float32),
                            pltpu.VMEM((tm, r), jnp.float32)],
        ),
        compiler_params=pltpu.CompilerParams(
            dimension_semantics=("parallel", "parallel", "arbitrary"),
            vmem_limit_bytes=VMEM_LIMIT),
    )(scale.reshape(-1), x2d, w_fp8, lora_down, lora_up)


def fused_gate_up_silu(x2d, w1_fp8, s1, d1, u1, w3_fp8, s3, d3, u3, lora_scale,
                       use_lora=True, *, out_dtype=jnp.bfloat16):
    """silu(linear_lora(x, w1)) * linear_lora(x, w3), single fused kernel."""
    M, K = x2d.shape
    N = w1_fp8.shape[0]
    r = d1.shape[0]
    r2 = 2 * r
    tm, tn, tk = _pick_tiles(M, N, K)
    n_sub, k_sub, kb = tn // BLOCK, tk // BLOCK, K // BLOCK
    grid = (M // tm, N // tn, K // tk)

    # Batch both rank-r LoRA downs into one rank-2r dot per step; zero-pad the
    # up matrices so the epilogue needs no sub-128-lane slicing of t.
    d_cat = jnp.concatenate([d1, d3], axis=0)                        # (2r, K)
    z = jnp.zeros_like(u1)
    u1p = jnp.concatenate([u1, z], axis=1)                           # (N, 2r)
    u3p = jnp.concatenate([z, u3], axis=1)                           # (N, 2r)

    kernel = functools.partial(
        _gate_up_silu_kernel, lora_scale=float(lora_scale),
        n_sub=n_sub, k_sub=k_sub, kb=kb, use_lora=use_lora)
    return pl.pallas_call(
        kernel,
        out_shape=jax.ShapeDtypeStruct((M, N), out_dtype),
        grid_spec=pltpu.PrefetchScalarGridSpec(
            num_scalar_prefetch=2,                               # s1, s3 -> SMEM
            grid=grid,
            in_specs=[
                pl.BlockSpec((tm, tk), lambda i, j, k, s1, s3: (i, k)),  # x
                pl.BlockSpec((tn, tk), lambda i, j, k, s1, s3: (j, k)),  # w1 fp8
                pl.BlockSpec((tn, tk), lambda i, j, k, s1, s3: (j, k)),  # w3 fp8
                pl.BlockSpec((r2, tk), lambda i, j, k, s1, s3: (0, k)),  # [d1;d3]
                pl.BlockSpec((tn, r2), lambda i, j, k, s1, s3: (j, 0)),  # [u1|0]
                pl.BlockSpec((tn, r2), lambda i, j, k, s1, s3: (j, 0)),  # [0|u3]
            ],
            out_specs=pl.BlockSpec((tm, tn), lambda i, j, k, s1, s3: (i, j)),
            scratch_shapes=[pltpu.VMEM((tm, tn), jnp.float32),
                            pltpu.VMEM((tm, tn), jnp.float32),
                            pltpu.VMEM((tm, r2), jnp.float32)],
        ),
        compiler_params=pltpu.CompilerParams(
            dimension_semantics=("parallel", "parallel", "arbitrary"),
            vmem_limit_bytes=VMEM_LIMIT),
    )(s1.reshape(-1), s3.reshape(-1), x2d, w1_fp8, w3_fp8, d_cat, u1p, u3p)


# ----------------------------------------------------------------------------
# Module-level wrapper mirroring MLP.forward
# ----------------------------------------------------------------------------
@functools.partial(jax.jit, static_argnames=("lora_scale", "use_lora"))
def mlp_forward(x, w1_fp8, s1, d1, u1, w3_fp8, s3, d3, u3,
                w2_fp8, s2, d2, u2, lora_scale=2.0, use_lora=True):
    """MLP.forward: w2(silu(w1(x)) * w3(x)), bias=False, eval-mode dropout."""
    # TODO(synk): tensor-parallel sharding / all_reduce of Column/RowParallelLinear
    #             is not implemented; this is the single-device (world_size==1) path.
    # TODO(synk): training-mode LoRA dropout not implemented (eval-mode identity).
    B, S, K = x.shape
    x2d = x.reshape(B * S, K).astype(jnp.bfloat16)
    ls = float(lora_scale)
    h = fused_gate_up_silu(x2d, w1_fp8, s1, d1, u1, w3_fp8, s3, d3, u3, ls,
                           use_lora=use_lora)
    y = fused_linear_lora(h, w2_fp8, s2, d2, u2, ls, use_lora=use_lora)
    return y.reshape(B, S, -1)


# ----------------------------------------------------------------------------
# Deterministic synthetic parameters + pure-JAX reference + check
# ----------------------------------------------------------------------------
def make_linear_params(key, out_features, in_features, rank):
    k_w, k_d, k_u = jax.random.split(key, 3)

    # fp8 weight with per-128x128-block scales (simulated blockwise quantization)
    w_full = jax.random.normal(k_w, (out_features, in_features), jnp.float32) * 0.02
    nb, kb = out_features // BLOCK, in_features // BLOCK
    w_blk = w_full.reshape(nb, BLOCK, kb, BLOCK)
    amax = jnp.max(jnp.abs(w_blk), axis=(1, 3))
    scale = (amax / FP8_MAX).astype(jnp.float32)                 # (nb, kb)
    w_fp8 = (w_blk / scale[:, None, :, None]).astype(jnp.float8_e4m3fn)
    w_fp8 = w_fp8.reshape(out_features, in_features)

    # lora_down: kaiming_uniform(a=sqrt(5)); lora_up: real init is zeros, use small
    # non-zero values so the LoRA path is actually exercised by the check.
    bound = 1.0 / np.sqrt(in_features)
    lora_down = jax.random.uniform(k_d, (rank, in_features), jnp.float32,
                                   -bound, bound).astype(jnp.bfloat16)
    lora_up = (jax.random.normal(k_u, (out_features, rank), jnp.float32)
               * 0.02).astype(jnp.bfloat16)
    return w_fp8, scale, lora_down, lora_up


def _ref_dequant(w_fp8, scale):
    N, K = w_fp8.shape
    nb, kb = N // BLOCK, K // BLOCK
    return (w_fp8.astype(jnp.float32).reshape(nb, BLOCK, kb, BLOCK)
            * scale[:, None, :, None]).reshape(N, K)


def _ref_linear(x2d, params, lora_scale):
    w_fp8, scale, down, up = params
    w_dq = _ref_dequant(w_fp8, scale)
    y = x2d @ w_dq.T
    lora = (x2d @ down.astype(jnp.float32).T) @ up.astype(jnp.float32).T
    return y + lora_scale * lora


def ref_mlp(x, p1, p3, p2, lora_scale):
    B, S, K = x.shape
    x2d = x.reshape(B * S, K).astype(jnp.float32)
    h1 = _ref_linear(x2d, p1, lora_scale)
    h3 = _ref_linear(x2d, p3, lora_scale)
    h = h1 * jax.nn.sigmoid(h1) * h3
    h = h.astype(jnp.bfloat16).astype(jnp.float32)   # kernel writes bf16 intermediate
    y = _ref_linear(h, p2, lora_scale)
    return y.reshape(B, S, -1)


if __name__ == "__main__":
    B, S = 2, 8
    dim, inter_dim = 256, 512
    rank, alpha = 8, 16
    lora_scale = float(alpha) / float(rank)

    key = jax.random.PRNGKey(0)
    k1, k2, k3, kx = jax.random.split(key, 4)
    w1_fp8, s1, d1, u1 = make_linear_params(k1, inter_dim, dim, rank)   # up_proj
    w3_fp8, s3, d3, u3 = make_linear_params(k3, inter_dim, dim, rank)   # gate_proj
    w2_fp8, s2, d2, u2 = make_linear_params(k2, dim, inter_dim, rank)   # down_proj

    x = jax.random.normal(kx, (B, S, dim), jnp.float32).astype(jnp.bfloat16)

    y = mlp_forward(x, w1_fp8, s1, d1, u1, w3_fp8, s3, d3, u3,
                    w2_fp8, s2, d2, u2, lora_scale=lora_scale, use_lora=True)
    y = jax.block_until_ready(y)

    y_ref = ref_mlp(x, (w1_fp8, s1, d1, u1), (w3_fp8, s3, d3, u3),
                    (w2_fp8, s2, d2, u2), lora_scale)
    np.testing.assert_allclose(np.asarray(y, np.float32),
                               np.asarray(y_ref, np.float32),
                               rtol=2e-2, atol=2e-2)
    print("KERNEL_OK")
</pallas_src>

<mosaic_0001>
module attributes {stable_mosaic.version = 11 : i64} {
  func.func @_gate_up_silu_kernel(%arg0: i32, %arg1: i32, %arg2: i32, %arg3: memref<8xf32, #tpu.memory_space<smem>>, %arg4: memref<8xf32, #tpu.memory_space<smem>>, %arg5: memref<16x256xbf16, #tpu.memory_space<vmem>>, %arg6: memref<256x256xf8E4M3FN, #tpu.memory_space<vmem>>, %arg7: memref<256x256xf8E4M3FN, #tpu.memory_space<vmem>>, %arg8: memref<16x256xbf16, #tpu.memory_space<vmem>>, %arg9: memref<256x16xbf16, #tpu.memory_space<vmem>>, %arg10: memref<256x16xbf16, #tpu.memory_space<vmem>>, %arg11: memref<16x256xbf16, #tpu.memory_space<vmem>>, %arg12: memref<16x256xf32, #tpu.memory_space<vmem>>, %arg13: memref<16x256xf32, #tpu.memory_space<vmem>>, %arg14: memref<16x16xf32, #tpu.memory_space<vmem>>) attributes {dimension_semantics = [#tpu.dimension_semantics<parallel>, #tpu.dimension_semantics<parallel>, #tpu.dimension_semantics<arbitrary>], iteration_bounds = array<i64: 1, 2, 1>, scalar_prefetch = 2 : i64, scratch_operands = 3 : i64, tpu.core_type = #tpu.core_type<tc>, window_params = [{transform_indices = @transform_0, window_bounds = array<i64: 16, 256>}, {transform_indices = @transform_1, window_bounds = array<i64: 256, 256>}, {transform_indices = @transform_2, window_bounds = array<i64: 256, 256>}, {transform_indices = @transform_3, window_bounds = array<i64: 16, 256>}, {transform_indices = @transform_4, window_bounds = array<i64: 256, 16>}, {transform_indices = @transform_5, window_bounds = array<i64: 256, 16>}, {transform_indices = @transform_6, window_bounds = array<i64: 16, 256>}]} {
    %c0_i32 = arith.constant 0 : i32
    %0 = arith.cmpi eq, %arg2, %c0_i32 : i32
    %1 = arith.extui %0 : i1 to i32
    %c0_i32_0 = arith.constant 0 : i32
    %2 = arith.cmpi ne, %1, %c0_i32_0 : i32
    scf.if %2 {
      %cst_73 = arith.constant 0.000000e+00 : f32
      %138 = vector.broadcast %cst_73 : f32 to vector<16x256xf32>
      %c0_74 = arith.constant 0 : index
      %c0_75 = arith.constant 0 : index
      %139 = vector.load %arg12[%c0_74, %c0_75] : memref<16x256xf32, #tpu.memory_space<vmem>>, vector<16x256xf32>
      tpu.vector_store %arg12[%c0_74, %c0_75], %138 {strides = array<i32>} : memref<16x256xf32, #tpu.memory_space<vmem>>, vector<16x256xf32>,
      %cst_76 = arith.constant 0.000000e+00 : f32
      %140 = vector.broadcast %cst_76 : f32 to vector<16x256xf32>
      %c0_77 = arith.constant 0 : index
      %c0_78 = arith.constant 0 : index
      %141 = vector.load %arg13[%c0_77, %c0_78] : memref<16x256xf32, #tpu.memory_space<vmem>>, vector<16x256xf32>
      tpu.vector_store %arg13[%c0_77, %c0_78], %140 {strides = array<i32>} : memref<16x256xf32, #tpu.memory_space<vmem>>, vector<16x256xf32>,
      %cst_79 = arith.constant 0.000000e+00 : f32
      %142 = vector.broadcast %cst_79 : f32 to vector<16x16xf32>
      %c0_80 = arith.constant 0 : index
      %c0_81 = arith.constant 0 : index
      %143 = vector.load %arg14[%c0_80, %c0_81] : memref<16x16xf32, #tpu.memory_space<vmem>>, vector<16x16xf32>
      tpu.vector_store %arg14[%c0_80, %c0_81], %142 {strides = array<i32>} : memref<16x16xf32, #tpu.memory_space<vmem>>, vector<16x16xf32>,
    } else {
    }
    %c0 = arith.constant 0 : index
    %c0_1 = arith.constant 0 : index
    %3 = vector.load %arg5[%c0, %c0_1] : memref<16x256xbf16, #tpu.memory_space<vmem>>, vector<16x256xbf16>
    %c0_2 = arith.constant 0 : index
    %c0_3 = arith.constant 0 : index
    %4 = vector.load %arg14[%c0_2, %c0_3] : memref<16x16xf32, #tpu.memory_space<vmem>>, vector<16x16xf32>
    %c0_4 = arith.constant 0 : index
    %c0_5 = arith.constant 0 : index
    %5 = vector.load %arg8[%c0_4, %c0_5] : memref<16x256xbf16, #tpu.memory_space<vmem>>, vector<16x256xbf16>
    %cst = arith.constant dense<0.000000e+00> : vector<16x16xf32>
    %6 = tpu.matmul %3, %5, %cst {dimension_numbers = #tpu.dot_dimension_numbers<[1], [1], [0], [0], [0, 0, 1, 0], [], []>} : vector<16x256xbf16>, vector<16x256xbf16>, vector<16x16xf32> -> vector<16x16xf32>
    %7 = arith.addf %4, %6 : vector<16x16xf32>
    %c0_6 = arith.constant 0 : index
    %c0_7 = arith.constant 0 : index
    %8 = vector.load %arg14[%c0_6, %c0_7] : memref<16x16xf32, #tpu.memory_space<vmem>>, vector<16x16xf32>
    tpu.vector_store %arg14[%c0_6, %c0_7], %7 {strides = array<i32>} : memref<16x16xf32, #tpu.memory_space<vmem>>, vector<16x16xf32>,
    %c2_i32 = arith.constant 2 : i32
    %9 = arith.muli %arg1, %c2_i32 : i32
    %c0_i32_8 = arith.constant 0 : i32
    %10 = arith.addi %9, %c0_i32_8 : i32
    %c2_i32_9 = arith.constant 2 : i32
    %11 = arith.muli %10, %c2_i32_9 : i32
    %c2_i32_10 = arith.constant 2 : i32
    %12 = arith.muli %arg2, %c2_i32_10 : i32
    %c0_i32_11 = arith.constant 0 : i32
    %13 = arith.addi %12, %c0_i32_11 : i32
    %14 = arith.addi %11, %13 : i32
    %15 = arith.index_cast %14 : i32 to index
    %16 = memref.load %arg3[%15] : memref<8xf32, #tpu.memory_space<smem>>
    %c0_12 = arith.constant 0 : index
    %c0_13 = arith.constant 0 : index
    %17 = vector.load %arg6[%c0_12, %c0_13] : memref<256x256xf8E4M3FN, #tpu.memory_space<vmem>>, vector<128x128xf8E4M3FN>
    %18 = arith.extf %17 : vector<128x128xf8E4M3FN> to vector<128x128xbf16>
    %19 = arith.extf %18 : vector<128x128xbf16> to vector<128x128xf32>
    %20 = vector.broadcast %16 : f32 to vector<128x128xf32>
    %21 = arith.mulf %19, %20 : vector<128x128xf32>
    %22 = arith.truncf %21 : vector<128x128xf32> to vector<128x128xbf16>
    %c2_i32_14 = arith.constant 2 : i32
    %23 = arith.muli %arg1, %c2_i32_14 : i32
    %c0_i32_15 = arith.constant 0 : i32
    %24 = arith.addi %23, %c0_i32_15 : i32
    %c2_i32_16 = arith.constant 2 : i32
    %25 = arith.muli %24, %c2_i32_16 : i32
    %c2_i32_17 = arith.constant 2 : i32
    %26 = arith.muli %arg2, %c2_i32_17 : i32
    %c1_i32 = arith.constant 1 : i32
    %27 = arith.addi %26, %c1_i32 : i32
    %28 = arith.addi %25, %27 : i32
    %29 = arith.index_cast %28 : i32 to index
    %30 = memref.load %arg3[%29] : memref<8xf32, #tpu.memory_space<smem>>
    %c0_18 = arith.constant 0 : index
    %c128 = arith.constant 128 : index
    %31 = vector.load %arg6[%c0_18, %c128] : memref<256x256xf8E4M3FN, #tpu.memory_space<vmem>>, vector<128x128xf8E4M3FN>
    %32 = arith.extf %31 : vector<128x128xf8E4M3FN> to vector<128x128xbf16>
    %33 = arith.extf %32 : vector<128x128xbf16> to vector<128x128xf32>
    %34 = vector.broadcast %30 : f32 to vector<128x128xf32>
    %35 = arith.mulf %33, %34 : vector<128x128xf32>
    %36 = arith.truncf %35 : vector<128x128xf32> to vector<128x128xbf16>
    %37 = tpu.concatenate %22, %36 in 1 : vector<128x128xbf16>, vector<128x128xbf16> -> vector<128x256xbf16>
    %c2_i32_19 = arith.constant 2 : i32
    %38 = arith.muli %arg1, %c2_i32_19 : i32
    %c1_i32_20 = arith.constant 1 : i32
    %39 = arith.addi %38, %c1_i32_20 : i32
    %c2_i32_21 = arith.constant 2 : i32
    %40 = arith.muli %39, %c2_i32_21 : i32
    %c2_i32_22 = arith.constant 2 : i32
    %41 = arith.muli %arg2, %c2_i32_22 : i32
    %c0_i32_23 = arith.constant 0 : i32
    %42 = arith.addi %41, %c0_i32_23 : i32
    %43 = arith.addi %40, %42 : i32
    %44 = arith.index_cast %43 : i32 to index
    %45 = memref.load %arg3[%44] : memref<8xf32, #tpu.memory_space<smem>>
    %c128_24 = arith.constant 128 : index
    %c0_25 = arith.constant 0 : index
    %46 = vector.load %arg6[%c128_24, %c0_25] : memref<256x256xf8E4M3FN, #tpu.memory_space<vmem>>, vector<128x128xf8E4M3FN>
    %47 = arith.extf %46 : vector<128x128xf8E4M3FN> to vector<128x128xbf16>
    %48 = arith.extf %47 : vector<128x128xbf16> to vector<128x128xf32>
    %49 = vector.broadcast %45 : f32 to vector<128x128xf32>
    %50 = arith.mulf %48, %49 : vector<128x128xf32>
    %51 = arith.truncf %50 : vector<128x128xf32> to vector<128x128xbf16>
    %c2_i32_26 = arith.constant 2 : i32
    %52 = arith.muli %arg1, %c2_i32_26 : i32
    %c1_i32_27 = arith.constant 1 : i32
    %53 = arith.addi %52, %c1_i32_27 : i32
    %c2_i32_28 = arith.constant 2 : i32
    %54 = arith.muli %53, %c2_i32_28 : i32
    %c2_i32_29 = arith.constant 2 : i32
    %55 = arith.muli %arg2, %c2_i32_29 : i32
    %c1_i32_30 = arith.constant 1 : i32
    %56 = arith.addi %55, %c1_i32_30 : i32
    %57 = arith.addi %54, %56 : i32
    %58 = arith.index_cast %57 : i32 to index
    %59 = memref.load %arg3[%58] : memref<8xf32, #tpu.memory_space<smem>>
    %c128_31 = arith.constant 128 : index
    %c128_32 = arith.constant 128 : index
    %60 = vector.load %arg6[%c128_31, %c128_32] : memref<256x256xf8E4M3FN, #tpu.memory_space<vmem>>, vector<128x128xf8E4M3FN>
    %61 = arith.extf %60 : vector<128x128xf8E4M3FN> to vector<128x128xbf16>
    %62 = arith.extf %61 : vector<128x128xbf16> to vector<128x128xf32>
    %63 = vector.broadcast %59 : f32 to vector<128x128xf32>
    %64 = arith.mulf %62, %63 : vector<128x128xf32>
    %65 = arith.truncf %64 : vector<128x128xf32> to vector<128x128xbf16>
    %66 = tpu.concatenate %51, %65 in 1 : vector<128x128xbf16>, vector<128x128xbf16> -> vector<128x256xbf16>
    %67 = tpu.concatenate %37, %66 in 0 : vector<128x256xbf16>, vector<128x256xbf16> -> vector<256x256xbf16>
    %c0_33 = arith.constant 0 : index
    %c0_34 = arith.constant 0 : index
    %68 = vector.load %arg12[%c0_33, %c0_34] : memref<16x256xf32, #tpu.memory_space<vmem>>, vector<16x256xf32>
    %cst_35 = arith.constant dense<0.000000e+00> : vector<16x256xf32>
    %69 = tpu.matmul %3, %67, %cst_35 {dimension_numbers = #tpu.dot_dimension_numbers<[1], [1], [0], [0], [0, 0, 1, 0], [], []>} : vector<16x256xbf16>, vector<256x256xbf16>, vector<16x256xf32> -> vector<16x256xf32>
    %70 = arith.addf %68, %69 : vector<16x256xf32>
    %c0_36 = arith.constant 0 : index
    %c0_37 = arith.constant 0 : index
    %71 = vector.load %arg12[%c0_36, %c0_37] : memref<16x256xf32, #tpu.memory_space<vmem>>, vector<16x256xf32>
    tpu.vector_store %arg12[%c0_36, %c0_37], %70 {strides = array<i32>} : memref<16x256xf32, #tpu.memory_space<vmem>>, vector<16x256xf32>,
    %c2_i32_38 = arith.constant 2 : i32
    %72 = arith.muli %arg1, %c2_i32_38 : i32
    %c0_i32_39 = arith.constant 0 : i32
    %73 = arith.addi %72, %c0_i32_39 : i32
    %c2_i32_40 = arith.constant 2 : i32
    %74 = arith.muli %73, %c2_i32_40 : i32
    %c2_i32_41 = arith.constant 2 : i32
    %75 = arith.muli %arg2, %c2_i32_41 : i32
    %c0_i32_42 = arith.constant 0 : i32
    %76 = arith.addi %75, %c0_i32_42 : i32
    %77 = arith.addi %74, %76 : i32
    %78 = arith.index_cast %77 : i32 to index
    %79 = memref.load %arg4[%78] : memref<8xf32, #tpu.memory_space<smem>>
    %c0_43 = arith.constant 0 : index
    %c0_44 = arith.constant 0 : index
    %80 = vector.load %arg7[%c0_43, %c0_44] : memref<256x256xf8E4M3FN, #tpu.memory_space<vmem>>, vector<128x128xf8E4M3FN>
    %81 = arith.extf %80 : vector<128x128xf8E4M3FN> to vector<128x128xbf16>
    %82 = arith.extf %81 : vector<128x128xbf16> to vector<128x128xf32>
    %83 = vector.broadcast %79 : f32 to vector<128x128xf32>
    %84 = arith.mulf %82, %83 : vector<128x128xf32>
    %85 = arith.truncf %84 : vector<128x128xf32> to vector<128x128xbf16>
    %c2_i32_45 = arith.constant 2 : i32
    %86 = arith.muli %arg1, %c2_i32_45 : i32
    %c0_i32_46 = arith.constant 0 : i32
    %87 = arith.addi %86, %c0_i32_46 : i32
    %c2_i32_47 = arith.constant 2 : i32
    %88 = arith.muli %87, %c2_i32_47 : i32
    %c2_i32_48 = arith.constant 2 : i32
    %89 = arith.muli %arg2, %c2_i32_48 : i32
    %c1_i32_49 = arith.constant 1 : i32
    %90 = arith.addi %89, %c1_i32_49 : i32
    %91 = arith.addi %88, %90 : i32
    %92 = arith.index_cast %91 : i32 to index
    %93 = memref.load %arg4[%92] : memref<8xf32, #tpu.memory_space<smem>>
    %c0_50 = arith.constant 0 : index
    %c128_51 = arith.constant 128 : index
    %94 = vector.load %arg7[%c0_50, %c128_51] : memref<256x256xf8E4M3FN, #tpu.memory_space<vmem>>, vector<128x128xf8E4M3FN>
    %95 = arith.extf %94 : vector<128x128xf8E4M3FN> to vector<128x128xbf16>
    %96 = arith.extf %95 : vector<128x128xbf16> to vector<128x128xf32>
    %97 = vector.broadcast %93 : f32 to vector<128x128xf32>
    %98 = arith.mulf %96, %97 : vector<128x128xf32>
    %99 = arith.truncf %98 : vector<128x128xf32> to vector<128x128xbf16>
    %100 = tpu.concatenate %85, %99 in 1 : vector<128x128xbf16>, vector<128x128xbf16> -> vector<128x256xbf16>
    %c2_i32_52 = arith.constant 2 : i32
    %101 = arith.muli %arg1, %c2_i32_52 : i32
    %c1_i32_53 = arith.constant 1 : i32
    %102 = arith.addi %101, %c1_i32_53 : i32
    %c2_i32_54 = arith.constant 2 : i32
    %103 = arith.muli %102, %c2_i32_54 : i32
    %c2_i32_55 = arith.constant 2 : i32
    %104 = arith.muli %arg2, %c2_i32_55 : i32
    %c0_i32_56 = arith.constant 0 : i32
    %105 = arith.addi %104, %c0_i32_56 : i32
    %106 = arith.addi %103, %105 : i32
    %107 = arith.index_cast %106 : i32 to index
    %108 = memref.load %arg4[%107] : memref<8xf32, #tpu.memory_space<smem>>
    %c128_57 = arith.constant 128 : index
    %c0_58 = arith.constant 0 : index
    %109 = vector.load %arg7[%c128_57, %c0_58] : memref<256x256xf8E4M3FN, #tpu.memory_space<vmem>>, vector<128x128xf8E4M3FN>
    %110 = arith.extf %109 : vector<128x128xf8E4M3FN> to vector<128x128xbf16>
    %111 = arith.extf %110 : vector<128x128xbf16> to vector<128x128xf32>
    %112 = vector.broadcast %108 : f32 to vector<128x128xf32>
    %113 = arith.mulf %111, %112 : vector<128x128xf32>
    %114 = arith.truncf %113 : vector<128x128xf32> to vector<128x128xbf16>
    %c2_i32_59 = arith.constant 2 : i32
    %115 = arith.muli %arg1, %c2_i32_59 : i32
    %c1_i32_60 = arith.constant 1 : i32
    %116 = arith.addi %115, %c1_i32_60 : i32
    %c2_i32_61 = arith.constant 2 : i32
    %117 = arith.muli %116, %c2_i32_61 : i32
    %c2_i32_62 = arith.constant 2 : i32
    %118 = arith.muli %arg2, %c2_i32_62 : i32
    %c1_i32_63 = arith.constant 1 : i32
    %119 = arith.addi %118, %c1_i32_63 : i32
    %120 = arith.addi %117, %119 : i32
    %121 = arith.index_cast %120 : i32 to index
    %122 = memref.load %arg4[%121] : memref<8xf32, #tpu.memory_space<smem>>
    %c128_64 = arith.constant 128 : index
    %c128_65 = arith.constant 128 : index
    %123 = vector.load %arg7[%c128_64, %c128_65] : memref<256x256xf8E4M3FN, #tpu.memory_space<vmem>>, vector<128x128xf8E4M3FN>
    %124 = arith.extf %123 : vector<128x128xf8E4M3FN> to vector<128x128xbf16>
    %125 = arith.extf %124 : vector<128x128xbf16> to vector<128x128xf32>
    %126 = vector.broadcast %122 : f32 to vector<128x128xf32>
    %127 = arith.mulf %125, %126 : vector<128x128xf32>
    %128 = arith.truncf %127 : vector<128x128xf32> to vector<128x128xbf16>
    %129 = tpu.concatenate %114, %128 in 1 : vector<128x128xbf16>, vector<128x128xbf16> -> vector<128x256xbf16>
    %130 = tpu.concatenate %100, %129 in 0 : vector<128x256xbf16>, vector<128x256xbf16> -> vector<256x256xbf16>
    %c0_66 = arith.constant 0 : index
    %c0_67 = arith.constant 0 : index
    %131 = vector.load %arg13[%c0_66, %c0_67] : memref<16x256xf32, #tpu.memory_space<vmem>>, vector<16x256xf32>
    %cst_68 = arith.constant dense<0.000000e+00> : vector<16x256xf32>
    %132 = tpu.matmul %3, %130, %cst_68 {dimension_numbers = #tpu.dot_dimension_numbers<[1], [1], [0], [0], [0, 0, 1, 0], [], []>} : vector<16x256xbf16>, vector<256x256xbf16>, vector<16x256xf32> -> vector<16x256xf32>
    %133 = arith.addf %131, %132 : vector<16x256xf32>
    %c0_69 = arith.constant 0 : index
    %c0_70 = arith.constant 0 : index
    %134 = vector.load %arg13[%c0_69, %c0_70] : memref<16x256xf32, #tpu.memory_space<vmem>>, vector<16x256xf32>
    tpu.vector_store %arg13[%c0_69, %c0_70], %133 {strides = array<i32>} : memref<16x256xf32, #tpu.memory_space<vmem>>, vector<16x256xf32>,
    %c0_i32_71 = arith.constant 0 : i32
    %135 = arith.cmpi eq, %arg2, %c0_i32_71 : i32
    %136 = arith.extui %135 : i1 to i32
    %c0_i32_72 = arith.constant 0 : i32
    %137 = arith.cmpi ne, %136, %c0_i32_72 : i32
    scf.if %137 {
      %c0_73 = arith.constant 0 : index
      %c0_74 = arith.constant 0 : index
      %138 = vector.load %arg12[%c0_73, %c0_74] : memref<16x256xf32, #tpu.memory_space<vmem>>, vector<16x256xf32>
      %c0_75 = arith.constant 0 : index
      %c0_76 = arith.constant 0 : index
      %139 = vector.load %arg13[%c0_75, %c0_76] : memref<16x256xf32, #tpu.memory_space<vmem>>, vector<16x256xf32>
      %c0_77 = arith.constant 0 : index
      %c0_78 = arith.constant 0 : index
      %140 = vector.load %arg14[%c0_77, %c0_78] : memref<16x16xf32, #tpu.memory_space<vmem>>, vector<16x16xf32>
      %141 = arith.truncf %140 : vector<16x16xf32> to vector<16x16xbf16>
      %c0_79 = arith.constant 0 : index
      %c0_80 = arith.constant 0 : index
      %142 = vector.load %arg9[%c0_79, %c0_80] : memref<256x16xbf16, #tpu.memory_space<vmem>>, vector<256x16xbf16>
      %cst_81 = arith.constant dense<0.000000e+00> : vector<16x256xf32>
      %143 = tpu.matmul %141, %142, %cst_81 {dimension_numbers = #tpu.dot_dimension_numbers<[1], [1], [0], [0], [0, 0, 1, 0], [], []>} : vector<16x16xbf16>, vector<256x16xbf16>, vector<16x256xf32> -> vector<16x256xf32>
      %cst_82 = arith.constant 2.000000e+00 : f32
      %144 = vector.broadcast %cst_82 : f32 to vector<16x256xf32>
      %145 = arith.mulf %144, %143 : vector<16x256xf32>
      %146 = arith.addf %138, %145 : vector<16x256xf32>
      %c0_83 = arith.constant 0 : index
      %c0_84 = arith.constant 0 : index
      %147 = vector.load %arg10[%c0_83, %c0_84] : memref<256x16xbf16, #tpu.memory_space<vmem>>, vector<256x16xbf16>
      %cst_85 = arith.constant dense<0.000000e+00> : vector<16x256xf32>
      %148 = tpu.matmul %141, %147, %cst_85 {dimension_numbers = #tpu.dot_dimension_numbers<[1], [1], [0], [0], [0, 0, 1, 0], [], []>} : vector<16x16xbf16>, vector<256x16xbf16>, vector<16x256xf32> -> vector<16x256xf32>
      %cst_86 = arith.constant 2.000000e+00 : f32
      %149 = vector.broadcast %cst_86 : f32 to vector<16x256xf32>
      %150 = arith.mulf %149, %148 : vector<16x256xf32>
      %151 = arith.addf %139, %150 : vector<16x256xf32>
      %152 = arith.negf %146 : vector<16x256xf32>
      %153 = math.exp %152 : vector<16x256xf32>
      %cst_87 = arith.constant 1.000000e+00 : f32
      %154 = vector.broadcast %cst_87 : f32 to vector<16x256xf32>
      %155 = arith.addf %154, %153 : vector<16x256xf32>
      %156 = arith.divf %154, %155 : vector<16x256xf32>
      %157 = arith.mulf %146, %156 : vector<16x256xf32>
      %158 = arith.mulf %157, %151 : vector<16x256xf32>
      %159 = arith.truncf %158 : vector<16x256xf32> to vector<16x256xbf16>
      %c0_88 = arith.constant 0 : index
      %c0_89 = arith.constant 0 : index
      %160 = vector.load %arg11[%c0_88, %c0_89] : memref<16x256xbf16, #tpu.memory_space<vmem>>, vector<16x256xbf16>
      tpu.vector_store %arg11[%c0_88, %c0_89], %159 {strides = array<i32>} : memref<16x256xbf16, #tpu.memory_space<vmem>>, vector<16x256xbf16>,
    } else {
    }
    return
  }
  func.func @transform_0(%arg0: i32, %arg1: i32, %arg2: i32, %arg3: memref<8xf32, #tpu.memory_space<smem>>, %arg4: memref<8xf32, #tpu.memory_space<smem>>) -> (i32, i32) {
    %c0_i32 = arith.constant 0 : i32
    return %arg0, %arg2 : i32, i32
  }
  func.func @transform_1(%arg0: i32, %arg1: i32, %arg2: i32, %arg3: memref<8xf32, #tpu.memory_space<smem>>, %arg4: memref<8xf32, #tpu.memory_space<smem>>) -> (i32, i32) {
    %c0_i32 = arith.constant 0 : i32
    return %arg1, %arg2 : i32, i32
  }
  func.func @transform_2(%arg0: i32, %arg1: i32, %arg2: i32, %arg3: memref<8xf32, #tpu.memory_space<smem>>, %arg4: memref<8xf32, #tpu.memory_space<smem>>) -> (i32, i32) {
    %c0_i32 = arith.constant 0 : i32
    return %arg1, %arg2 : i32, i32
  }
  func.func @transform_3(%arg0: i32, %arg1: i32, %arg2: i32, %arg3: memref<8xf32, #tpu.memory_space<smem>>, %arg4: memref<8xf32, #tpu.memory_space<smem>>) -> (i32, i32) {
    %c0_i32 = arith.constant 0 : i32
    %c0_i32_0 = arith.constant 0 : i32
    return %c0_i32, %arg2 : i32, i32
  }
  func.func @transform_4(%arg0: i32, %arg1: i32, %arg2: i32, %arg3: memref<8xf32, #tpu.memory_space<smem>>, %arg4: memref<8xf32, #tpu.memory_space<smem>>) -> (i32, i32) {
    %c0_i32 = arith.constant 0 : i32
    %c0_i32_0 = arith.constant 0 : i32
    return %arg1, %c0_i32 : i32, i32
  }
  func.func @transform_5(%arg0: i32, %arg1: i32, %arg2: i32, %arg3: memref<8xf32, #tpu.memory_space<smem>>, %arg4: memref<8xf32, #tpu.memory_space<smem>>) -> (i32, i32) {
    %c0_i32 = arith.constant 0 : i32
    %c0_i32_0 = arith.constant 0 : i32
    return %arg1, %c0_i32 : i32, i32
  }
  func.func @transform_6(%arg0: i32, %arg1: i32, %arg2: i32, %arg3: memref<8xf32, #tpu.memory_space<smem>>, %arg4: memref<8xf32, #tpu.memory_space<smem>>) -> (i32, i32) {
    %c0_i32 = arith.constant 0 : i32
    return %arg0, %arg1 : i32, i32
  }
}

module attributes {stable_mosaic.version = 11 : i64} {
  func.func @_linear_lora_kernel(%arg0: i32, %arg1: i32, %arg2: i32, %arg3: memref<8xf32, #tpu.memory_space<smem>>, %arg4: memref<16x512xbf16, #tpu.memory_space<vmem>>, %arg5: memref<128x512xf8E4M3FN, #tpu.memory_space<vmem>>, %arg6: memref<8x512xbf16, #tpu.memory_space<vmem>>, %arg7: memref<128x8xbf16, #tpu.memory_space<vmem>>, %arg8: memref<16x128xbf16, #tpu.memory_space<vmem>>, %arg9: memref<16x128xf32, #tpu.memory_space<vmem>>, %arg10: memref<16x8xf32, #tpu.memory_space<vmem>>) attributes {dimension_semantics = [#tpu.dimension_semantics<parallel>, #tpu.dimension_semantics<parallel>, #tpu.dimension_semantics<arbitrary>], iteration_bounds = array<i64: 1, 2, 1>, scalar_prefetch = 1 : i64, scratch_operands = 2 : i64, tpu.core_type = #tpu.core_type<tc>, window_params = [{transform_indices = @transform_0, window_bounds = array<i64: 16, 512>}, {transform_indices = @transform_1, window_bounds = array<i64: 128, 512>}, {transform_indices = @transform_2, window_bounds = array<i64: 8, 512>}, {transform_indices = @transform_3, window_bounds = array<i64: 128, 8>}, {transform_indices = @transform_4, window_bounds = array<i64: 16, 128>}]} {
    %c0_i32 = arith.constant 0 : i32
    %0 = arith.cmpi eq, %arg2, %c0_i32 : i32
    %1 = arith.extui %0 : i1 to i32
    %c0_i32_0 = arith.constant 0 : i32
    %2 = arith.cmpi ne, %1, %c0_i32_0 : i32
    scf.if %2 {
      %cst_36 = arith.constant 0.000000e+00 : f32
      %73 = vector.broadcast %cst_36 : f32 to vector<16x128xf32>
      %c0_37 = arith.constant 0 : index
      %c0_38 = arith.constant 0 : index
      %74 = vector.load %arg9[%c0_37, %c0_38] : memref<16x128xf32, #tpu.memory_space<vmem>>, vector<16x128xf32>
      tpu.vector_store %arg9[%c0_37, %c0_38], %73 {strides = array<i32>} : memref<16x128xf32, #tpu.memory_space<vmem>>, vector<16x128xf32>,
      %cst_39 = arith.constant 0.000000e+00 : f32
      %75 = vector.broadcast %cst_39 : f32 to vector<16x8xf32>
      %c0_40 = arith.constant 0 : index
      %c0_41 = arith.constant 0 : index
      %76 = vector.load %arg10[%c0_40, %c0_41] : memref<16x8xf32, #tpu.memory_space<vmem>>, vector<16x8xf32>
      tpu.vector_store %arg10[%c0_40, %c0_41], %75 {strides = array<i32>} : memref<16x8xf32, #tpu.memory_space<vmem>>, vector<16x8xf32>,
    } else {
    }
    %c0 = arith.constant 0 : index
    %c0_1 = arith.constant 0 : index
    %3 = vector.load %arg4[%c0, %c0_1] : memref<16x512xbf16, #tpu.memory_space<vmem>>, vector<16x512xbf16>
    %c0_2 = arith.constant 0 : index
    %c0_3 = arith.constant 0 : index
    %4 = vector.load %arg10[%c0_2, %c0_3] : memref<16x8xf32, #tpu.memory_space<vmem>>, vector<16x8xf32>
    %c0_4 = arith.constant 0 : index
    %c0_5 = arith.constant 0 : index
    %5 = vector.load %arg6[%c0_4, %c0_5] : memref<8x512xbf16, #tpu.memory_space<vmem>>, vector<8x512xbf16>
    %cst = arith.constant dense<0.000000e+00> : vector<16x8xf32>
    %6 = tpu.matmul %3, %5, %cst {dimension_numbers = #tpu.dot_dimension_numbers<[1], [1], [0], [0], [0, 0, 1, 0], [], []>} : vector<16x512xbf16>, vector<8x512xbf16>, vector<16x8xf32> -> vector<16x8xf32>
    %7 = arith.addf %4, %6 : vector<16x8xf32>
    %c0_6 = arith.constant 0 : index
    %c0_7 = arith.constant 0 : index
    %8 = vector.load %arg10[%c0_6, %c0_7] : memref<16x8xf32, #tpu.memory_space<vmem>>, vector<16x8xf32>
    tpu.vector_store %arg10[%c0_6, %c0_7], %7 {strides = array<i32>} : memref<16x8xf32, #tpu.memory_space<vmem>>, vector<16x8xf32>,
    %c1_i32 = arith.constant 1 : i32
    %9 = arith.muli %arg1, %c1_i32 : i32
    %c0_i32_8 = arith.constant 0 : i32
    %10 = arith.addi %9, %c0_i32_8 : i32
    %c4_i32 = arith.constant 4 : i32
    %11 = arith.muli %10, %c4_i32 : i32
    %c4_i32_9 = arith.constant 4 : i32
    %12 = arith.muli %arg2, %c4_i32_9 : i32
    %c0_i32_10 = arith.constant 0 : i32
    %13 = arith.addi %12, %c0_i32_10 : i32
    %14 = arith.addi %11, %13 : i32
    %15 = arith.index_cast %14 : i32 to index
    %16 = memref.load %arg3[%15] : memref<8xf32, #tpu.memory_space<smem>>
    %c0_11 = arith.constant 0 : index
    %c0_12 = arith.constant 0 : index
    %17 = vector.load %arg5[%c0_11, %c0_12] : memref<128x512xf8E4M3FN, #tpu.memory_space<vmem>>, vector<128x128xf8E4M3FN>
    %18 = arith.extf %17 : vector<128x128xf8E4M3FN> to vector<128x128xbf16>
    %19 = arith.extf %18 : vector<128x128xbf16> to vector<128x128xf32>
    %20 = vector.broadcast %16 : f32 to vector<128x128xf32>
    %21 = arith.mulf %19, %20 : vector<128x128xf32>
    %22 = arith.truncf %21 : vector<128x128xf32> to vector<128x128xbf16>
    %c1_i32_13 = arith.constant 1 : i32
    %23 = arith.muli %arg1, %c1_i32_13 : i32
    %c0_i32_14 = arith.constant 0 : i32
    %24 = arith.addi %23, %c0_i32_14 : i32
    %c4_i32_15 = arith.constant 4 : i32
    %25 = arith.muli %24, %c4_i32_15 : i32
    %c4_i32_16 = arith.constant 4 : i32
    %26 = arith.muli %arg2, %c4_i32_16 : i32
    %c1_i32_17 = arith.constant 1 : i32
    %27 = arith.addi %26, %c1_i32_17 : i32
    %28 = arith.addi %25, %27 : i32
    %29 = arith.index_cast %28 : i32 to index
    %30 = memref.load %arg3[%29] : memref<8xf32, #tpu.memory_space<smem>>
    %c0_18 = arith.constant 0 : index
    %c128 = arith.constant 128 : index
    %31 = vector.load %arg5[%c0_18, %c128] : memref<128x512xf8E4M3FN, #tpu.memory_space<vmem>>, vector<128x128xf8E4M3FN>
    %32 = arith.extf %31 : vector<128x128xf8E4M3FN> to vector<128x128xbf16>
    %33 = arith.extf %32 : vector<128x128xbf16> to vector<128x128xf32>
    %34 = vector.broadcast %30 : f32 to vector<128x128xf32>
    %35 = arith.mulf %33, %34 : vector<128x128xf32>
    %36 = arith.truncf %35 : vector<128x128xf32> to vector<128x128xbf16>
    %c1_i32_19 = arith.constant 1 : i32
    %37 = arith.muli %arg1, %c1_i32_19 : i32
    %c0_i32_20 = arith.constant 0 : i32
    %38 = arith.addi %37, %c0_i32_20 : i32
    %c4_i32_21 = arith.constant 4 : i32
    %39 = arith.muli %38, %c4_i32_21 : i32
    %c4_i32_22 = arith.constant 4 : i32
    %40 = arith.muli %arg2, %c4_i32_22 : i32
    %c2_i32 = arith.constant 2 : i32
    %41 = arith.addi %40, %c2_i32 : i32
    %42 = arith.addi %39, %41 : i32
    %43 = arith.index_cast %42 : i32 to index
    %44 = memref.load %arg3[%43] : memref<8xf32, #tpu.memory_space<smem>>
    %c0_23 = arith.constant 0 : index
    %c256 = arith.constant 256 : index
    %45 = vector.load %arg5[%c0_23, %c256] : memref<128x512xf8E4M3FN, #tpu.memory_space<vmem>>, vector<128x128xf8E4M3FN>
    %46 = arith.extf %45 : vector<128x128xf8E4M3FN> to vector<128x128xbf16>
    %47 = arith.extf %46 : vector<128x128xbf16> to vector<128x128xf32>
    %48 = vector.broadcast %44 : f32 to vector<128x128xf32>
    %49 = arith.mulf %47, %48 : vector<128x128xf32>
    %50 = arith.truncf %49 : vector<128x128xf32> to vector<128x128xbf16>
    %c1_i32_24 = arith.constant 1 : i32
    %51 = arith.muli %arg1, %c1_i32_24 : i32
    %c0_i32_25 = arith.constant 0 : i32
    %52 = arith.addi %51, %c0_i32_25 : i32
    %c4_i32_26 = arith.constant 4 : i32
    %53 = arith.muli %52, %c4_i32_26 : i32
    %c4_i32_27 = arith.constant 4 : i32
    %54 = arith.muli %arg2, %c4_i32_27 : i32
    %c3_i32 = arith.constant 3 : i32
    %55 = arith.addi %54, %c3_i32 : i32
    %56 = arith.addi %53, %55 : i32
    %57 = arith.index_cast %56 : i32 to index
    %58 = memref.load %arg3[%57] : memref<8xf32, #tpu.memory_space<smem>>
    %c0_28 = arith.constant 0 : index
    %c384 = arith.constant 384 : index
    %59 = vector.load %arg5[%c0_28, %c384] : memref<128x512xf8E4M3FN, #tpu.memory_space<vmem>>, vector<128x128xf8E4M3FN>
    %60 = arith.extf %59 : vector<128x128xf8E4M3FN> to vector<128x128xbf16>
    %61 = arith.extf %60 : vector<128x128xbf16> to vector<128x128xf32>
    %62 = vector.broadcast %58 : f32 to vector<128x128xf32>
    %63 = arith.mulf %61, %62 : vector<128x128xf32>
    %64 = arith.truncf %63 : vector<128x128xf32> to vector<128x128xbf16>
    %65 = tpu.concatenate %22, %36, %50, %64 in 1 : vector<128x128xbf16>, vector<128x128xbf16>, vector<128x128xbf16>, vector<128x128xbf16> -> vector<128x512xbf16>
    %c0_29 = arith.constant 0 : index
    %c0_30 = arith.constant 0 : index
    %66 = vector.load %arg9[%c0_29, %c0_30] : memref<16x128xf32, #tpu.memory_space<vmem>>, vector<16x128xf32>
    %cst_31 = arith.constant dense<0.000000e+00> : vector<16x128xf32>
    %67 = tpu.matmul %3, %65, %cst_31 {dimension_numbers = #tpu.dot_dimension_numbers<[1], [1], [0], [0], [0, 0, 1, 0], [], []>} : vector<16x512xbf16>, vector<128x512xbf16>, vector<16x128xf32> -> vector<16x128xf32>
    %68 = arith.addf %66, %67 : vector<16x128xf32>
    %c0_32 = arith.constant 0 : index
    %c0_33 = arith.constant 0 : index
    %69 = vector.load %arg9[%c0_32, %c0_33] : memref<16x128xf32, #tpu.memory_space<vmem>>, vector<16x128xf32>
    tpu.vector_store %arg9[%c0_32, %c0_33], %68 {strides = array<i32>} : memref<16x128xf32, #tpu.memory_space<vmem>>, vector<16x128xf32>,
    %c0_i32_34 = arith.constant 0 : i32
    %70 = arith.cmpi eq, %arg2, %c0_i32_34 : i32
    %71 = arith.extui %70 : i1 to i32
    %c0_i32_35 = arith.constant 0 : i32
    %72 = arith.cmpi ne, %71, %c0_i32_35 : i32
    scf.if %72 {
      %c0_36 = arith.constant 0 : index
      %c0_37 = arith.constant 0 : index
      %73 = vector.load %arg9[%c0_36, %c0_37] : memref<16x128xf32, #tpu.memory_space<vmem>>, vector<16x128xf32>
      %c0_38 = arith.constant 0 : index
      %c0_39 = arith.constant 0 : index
      %74 = vector.load %arg10[%c0_38, %c0_39] : memref<16x8xf32, #tpu.memory_space<vmem>>, vector<16x8xf32>
      %75 = arith.truncf %74 : vector<16x8xf32> to vector<16x8xbf16>
      %c0_40 = arith.constant 0 : index
      %c0_41 = arith.constant 0 : index
      %76 = vector.load %arg7[%c0_40, %c0_41] : memref<128x8xbf16, #tpu.memory_space<vmem>>, vector<128x8xbf16>
      %cst_42 = arith.constant dense<0.000000e+00> : vector<16x128xf32>
      %77 = tpu.matmul %75, %76, %cst_42 {dimension_numbers = #tpu.dot_dimension_numbers<[1], [1], [0], [0], [0, 0, 1, 0], [], []>} : vector<16x8xbf16>, vector<128x8xbf16>, vector<16x128xf32> -> vector<16x128xf32>
      %cst_43 = arith.constant 2.000000e+00 : f32
      %78 = vector.broadcast %cst_43 : f32 to vector<16x128xf32>
      %79 = arith.mulf %78, %77 : vector<16x128xf32>
      %80 = arith.addf %73, %79 : vector<16x128xf32>
      %81 = arith.truncf %80 : vector<16x128xf32> to vector<16x128xbf16>
      %c0_44 = arith.constant 0 : index
      %c0_45 = arith.constant 0 : index
      %82 = vector.load %arg8[%c0_44, %c0_45] : memref<16x128xbf16, #tpu.memory_space<vmem>>, vector<16x128xbf16>
      tpu.vector_store %arg8[%c0_44, %c0_45], %81 {strides = array<i32>} : memref<16x128xbf16, #tpu.memory_space<vmem>>, vector<16x128xbf16>,
    } else {
    }
    return
  }
  func.func @transform_0(%arg0: i32, %arg1: i32, %arg2: i32, %arg3: memref<8xf32, #tpu.memory_space<smem>>) -> (i32, i32) {
    %c0_i32 = arith.constant 0 : i32
    return %arg0, %arg2 : i32, i32
  }
  func.func @transform_1(%arg0: i32, %arg1: i32, %arg2: i32, %arg3: memref<8xf32, #tpu.memory_space<smem>>) -> (i32, i32) {
    %c0_i32 = arith.constant 0 : i32
    return %arg1, %arg2 : i32, i32
  }
  func.func @transform_2(%arg0: i32, %arg1: i32, %arg2: i32, %arg3: memref<8xf32, #tpu.memory_space<smem>>) -> (i32, i32) {
    %c0_i32 = arith.constant 0 : i32
    %c0_i32_0 = arith.constant 0 : i32
    return %c0_i32, %arg2 : i32, i32
  }
  func.func @transform_3(%arg0: i32, %arg1: i32, %arg2: i32, %arg3: memref<8xf32, #tpu.memory_space<smem>>) -> (i32, i32) {
    %c0_i32 = arith.constant 0 : i32
    %c0_i32_0 = arith.constant 0 : i32
    return %arg1, %c0_i32 : i32, i32
  }
  func.func @transform_4(%arg0: i32, %arg1: i32, %arg2: i32, %arg3: memref<8xf32, #tpu.memory_space<smem>>) -> (i32, i32) {
    %c0_i32 = arith.constant 0 : i32
    return %arg0, %arg1 : i32, i32
  }
}

</mosaic_0001>

<bundles_post_ra>
// kernel: mlp_forward.3
= control target key start
LH: loop header
LB: loop body
LE: loop exit
PB: predicated region body
PF: predicated region fallthrough
CT: control target
= control target key end

     0   :  { %s1654_s0 = inlined_call_operand.vmem [shape: f32[8], index: 0, kind: input, shape index: {}]   ;;  %s1655_s1 = inlined_call_operand.vmem [shape: bf16[16,512], index: 1, kind: input, shape index: {}]   ;;  %s1656_s2 = inlined_call_operand.vmem [shape: f8e4m3fn[256,512], index: 2, kind: input, shape index: {}]   ;;  %s1657_s3 = inlined_call_operand.vmem [shape: bf16[8,512], index: 3, kind: input, shape index: {}]   ;;  %s1658_s4 = inlined_call_operand.vmem [shape: bf16[256,8], index: 4, kind: input, shape index: {}]   ;;  %s1659_s5 = inlined_call_operand.hbm [shape: bf16[16,256], index: 5, kind: output, shape index: {}]  }
   0x1   :  { %s10_s20 = sshll.u32 %s1654_s0, 4  ;;  %s11_s20 = int_to_ptr.vmem [resolvable:$true] %s10_s20 }
   0x2   :  { %s1227_s21 = scalar_lea.vmem %s11_s20, 16  ;;  %p1232_p1 = scmp.lt.s32.totalorder %s11_s20, %s11_s20 }
   0x3   :  { %p1228_p0 = scmp.ne.s32.totalorder %s11_s20, %s1227_s21  ;;  %p1233_p2 = scmp.lt.s32.totalorder %s1227_s21, %s1227_s21 }
   0x5   :  { %p1234_p3 = por %p1233_p2, %p1232_p1 }
   0x7   :  { %p1235_p4 = pnand %p1234_p3, %p1228_p0 }
   0x9   :  { %1238 = shalt.err (!%p1235_p4)  }
   0xa   :  { %s1321_s22 = smov [#allocation5]  }
   0xb   :  { %13 = dma.vmem_to_smem %s11_s20, 16, %s1321_s22, [#allocation4] }
   0xc   :  { %1291 = dma.done.wait [#allocation4], 16 }
   0xd   :  { %1292 = vsyncadd [#allocation4], 4294967280 }
   0xe   :  { %15 = sfence }
   0xf   :  { %16 = vsyncpa [#allocation7], 0 }
  0x10   :  { %18 = vsyncpa [#allocation7 + $0x1], 0  ;;  %s1361_s23 = smov 0   ;;  %s1363_s24 = smov 0  }
  0x11   :  { %s1365_s0 = smov 0   ;;  %s1367_s25 = smov 0  }
  0x12   :  { %s1369_s26 = smov 0   ;;  %s1371_s27 = smov 0  }
  0x13 LB: > { %s1074_s28 = sadd.s32 4294967295, %s1319_s27   ;;  %s1075_s29 = sadd.s32 4294967294, %s1319_s27   ;;  %s1319_s27 = sphi %s1371_s27, %s24_s27   ;;  %s1315_s26 = sphi %s1369_s26, %s1666_s26   ;;  %s1311_s25 = sphi %s1367_s25, %s1665_s25   ;;  %s1307_s0 = sphi %s1365_s0, %s1664_s0   ;;  %s1303_s24 = sphi %s1363_s24, %s1663_s24   ;;  %s1299_s23 = sphi %s1361_s23, %s1662_s23  }
  0x14   : > { %s39_s30 = sadd.s32 1, %s1315_s26  ;;  %s160_s6 = sadd.s32 1, %s1307_s0 }
  0x15   : > { %p41_p5 = scmp.ge.s32.totalorder %s39_s30, 2  ;;  %p170_p6 = scmp.ne.s32.totalorder %s1307_s0, %s1303_s24 }
  0x16   : > { %p171_p7 = scmp.eq.s32.totalorder %s1074_s28, 1  ;;  %p176_p8 = scmp.ne.s32.totalorder %s1303_s24, %s1299_s23 }
  0x17   : > { %s1668_s30 = smov (%p41_p5, %s39_s30), 0  ;;  %p177_p10 = scmp.eq.s32.totalorder %s1075_s29, 1 }
  0x18   : > { %p1401_p9 = por %p171_p7, %p170_p6  ;;  %s156_s8 = ssub.s32 %s1315_s26, %s1668_s30 }
  0x19   : > { %p1080_p11 = scmp.ge.s32.totalorder %s1319_s27, 1  ;;  %p158_p12 = scmp.eq.s32.totalorder %s156_s8, 0 }
  0x1a   : > { %p1408_p13 = por %p177_p10, %p176_p8  ;;  %p243_p0 = scmp.lt.s32.totalorder %s1319_s27, 3 }
  0x1b   : > { %s1414_s10 = scalar_select %p158_p12, %s1307_s0, %s160_s6  }
  0x1c   : > { %p244_p1 = pnand %p1080_p11, %p243_p0 }
  0x1d   : > { %v347_v0 = vld [vmem:[%s1657_s3] sm:$0xff] (!%p244_p1)  ;;  %s1420_s13 = sshll.u32 (!%p244_p1), %s1311_s25, 2  ;;  %v348_v4 = vld [vmem:[%s1657_s3 + $0x8] sm:$0xff] (!%p244_p1)  ;;  %s1085_s18 = sshll.u32 (!%p244_p1), %s1311_s25, 4  ;;  %vm338_vm0 = vcmask (!%p244_p1), 64512   ;;  %v1322_v6 = vmov (!%p244_p1), 0.0  }
  0x1e   : > { %247 = sbr.rel (%p244_p1) target bundleno = 512 (0x200), region = 36  ;;  %v1092_v1 = vcombine.high (!%p244_p1), %v347_v0, %v347_v0  ;;  %v1091_v2 = vcombine.low (!%p244_p1), %v347_v0, %v347_v0  ;;  %v1213_v3 = vld [vmem:[%s1655_s1 + $0x4] ss:$16 sps:$4 sm:$0xff] (!%p244_p1)   ;;  %p308_p2 = scmp.lt.s32.totalorder (!%p244_p1), %s1420_s13, 7  ;;  %v1094_v5 = vcombine.high (!%p244_p1), %v348_v4, %v348_v4  ;;  %339 = vst.msk [vmem:[#allocation3] sm:$0xff] (!%p244_p1), %vm338_vm0, %v1322_v6  ;;  %340 = vst.msk [vmem:[#allocation3 + $0x8] sm:$0xff] (!%p244_p1), %vm338_vm0, %v1322_v6 }
  0x1f   : > { %s528_s19 = sadd.s32 (!%p244_p1), 1, %s1420_s13  ;;  %s1432_s20 = sld [smem:[#allocation5 + %s1420_s13]] (!%p244_p1)  ;;  %415 = vmatprep.mubr.bf16.mxu1 (!%p244_p1), %v1213_v3  ;;  %729 = vmatprep.mubr.bf16.mxu0 (!%p244_p1), %v1213_v3  ;;  %v1445_v7 = vld [vmem:[%s1655_s1] ss:$16 sps:$4 sm:$0xff] (!%p244_p1)   ;;  %v1093_v8 = vcombine.low (!%p244_p1), %v348_v4, %v348_v4  ;;  %v1463_v12 = vld [vmem:[%s1655_s1 + $0xc] ss:$16 sps:$4 sm:$0xff] (!%p244_p1)  }
  0x20   : > { %383 = vmatprep.subr.bf16.mxu1 (!%p244_p1), %v1092_v1  ;;  %s1435_s22 = sld [smem:[#allocation5 + %s528_s19]] (!%p244_p1)  ;;  %s640_s28 = sadd.s32 (!%p244_p1), 3, %s1420_s13  ;;  %v1492_v38 = vld [vmem:[%s1655_s1 + $0x8] ss:$16 sps:$4 sm:$0xff] (!%p244_p1)   ;;  %vm1323_vm1 = vmmov (!%p244_p1), 0  }
  0x21   : > { %384 = vmatpush1.bf16.xpose.msra.mxu1 (!%p244_p1), %v1091_v2  ;;  %s641_s6 = sld [smem:[#allocation5 + %s640_s28]] (!%p244_p1)  ;;  %s584_s16 = sadd.s32 (!%p244_p1), 2, %s1420_s13 }
  0x22   : > { %424 = vmatprep.subr.bf16.mxu1 (!%p244_p1), %v1094_v5  ;;  %s1456_s17 = sld [smem:[#allocation5 + %s584_s16]] (!%p244_p1)  ;;  %p325_p3 = scmp.lt.s32.totalorder (!%p244_p1), %s1085_s18, 31 }
  0x23   : > { %s1108_s14 = sshll.u32 (!%p244_p1), %s1311_s25, 6  ;;  %s1324_s25 = smov (!%p244_p1), [#allocation6]  }
  0x25   : > { %s309_s21 = scalar_select %p308_p2, %s1420_s13, 7  ;;  %v1467_v18 = vstv %s1432_s20 }
  0x26   : > { %s1670_s18 = smov (!%p325_p3, %s1085_s18), 31  ;;  %v1472_v24 = vstv %s1435_s22 }
  0x27   : > { %s1111_s29 = sshll.u32 %s309_s21, 5  ;;  %v1475_v29 = vstv %s641_s6  ;;  %s1086_s13 = sshll.u32 %s1670_s18, 2 }
  0x28   : > { %s1450_s15 = scalar_lea.vmem %s1656_s2, %s1111_s29  ;;  %416 = vmatmul.mubr.bf16.vlgmr.msra.gmra.mrb[0].mxu1 %v1445_v7  ;;  %s1484_s28 = scalar_lea.vmem %s1658_s4, %s1086_s13  ;;  %v1495_v40 = vstv %s1456_s17 }
  0x29   : > { %v530_v9 = vld [vmem:[%s1450_s15 + $0x8] sm:$0xff]  ;;  %v474_v10 = vld [vmem:[%s1450_s15] sm:$0xff]  ;;  %v642_v11 = vld [vmem:[%s1450_s15 + $0x18] sm:$0xff]  ;;  %425 = vmatpush1.bf16.xpose.msra.mxu1 %v1093_v8  ;;  %456 = vmatprep.mubr.bf16.mxu1 %v1463_v12  ;;  %s291_s6 = sand.u32 1, %s1303_s24   ;;  %s1606_s17 = scalar_lea.hbm %s1659_s5, %s1108_s14 }
  0x2a   : > { %v534_v13 = vunpack.c.l.f8e4m3fn %v530_v9  ;;  %v535_v14 = vunpack.c.h.f8e4m3fn %v530_v9  ;;  %v478_v15 = vunpack.c.l.f8e4m3fn %v474_v10  ;;  %v479_v16 = vunpack.c.h.f8e4m3fn %v474_v10  ;;  %v586_v17 = vld [vmem:[%s1450_s15 + $0x10] sm:$0xff]  ;;  %v531_v47 = vld [vmem:[%s1450_s15 + $0x28] sm:$0xff]  ;;  %v475_v52 = vld [vmem:[%s1450_s15 + $0x20] sm:$0xff]  ;;  %s1081_s8 = sshll.u32 %s291_s6, 3  ;;  %s1608_s19 = scalar_lea.sflag [#allocation7], %s291_s6 }
  0x2b   : > { %v646_v19 = vunpack.c.l.f8e4m3fn %v642_v11  ;;  %v590_v20 = vunpack.c.l.f8e4m3fn %v586_v17  ;;  %v647_v21 = vunpack.c.h.f8e4m3fn %v642_v11  ;;  %v591_v56 = vunpack.c.h.f8e4m3fn %v586_v17  ;;  %v643_v57 = vld [vmem:[%s1450_s15 + $0x38] sm:$0xff]  ;;  %v587_v8 = vld [vmem:[%s1450_s15 + $0x30] sm:$0xff]  ;;  %s293_s11 = scalar_lea.vmem [#allocation6], %s1081_s8  ;;  %s1243_s13 = sshll.u32 %s1324_s25, 4  ;;  %s1244_s13 = int_to_ptr.vmem [resolvable:$false] %s1243_s13 }
  0x2c   : > { %v542_v22 = vunpack.c.l.bf16 %v534_v13  ;;  %v543_v23 = vunpack.c.h.bf16 %v534_v13  ;;  %v486_v25 = vunpack.c.l.bf16 %v478_v15  ;;  %v487_v26 = vunpack.c.h.bf16 %v478_v15  ;;  %s945_s12 = sshll.u32 %s293_s11, 4  ;;  %s1245_s20 = scalar_lea.vmem %s1244_s13, 256  ;;  %s1601_s12 = int_to_ptr.vmem [resolvable:$true] %s945_s12 }
  0x2d   : > { %v654_v27 = vunpack.c.l.bf16 %v646_v19  ;;  %v655_v28 = vunpack.c.h.bf16 %v646_v19  ;;  %v598_v33 = vunpack.c.l.bf16 %v590_v20  ;;  %v599_v37 = vunpack.c.h.bf16 %v590_v20  ;;  %s1239_s21 = scalar_lea.vmem %s1601_s12, 128  ;;  %p1246_p7 = scmp.lt.s32.totalorder %s1601_s12, %s1244_s13 }
  0x2e   : > { %v559_v30 = vmul.f32 %v1472_v24, %v542_v22  ;;  %v560_v31 = vmul.f32 %v1472_v24, %v543_v23  ;;  %v503_v32 = vmul.f32 %v1467_v18, %v486_v25  ;;  %v504_v34 = vmul.f32 %v1467_v18, %v487_v26  ;;  %p1240_p4 = scmp.ne.s32.totalorder %s1601_s12, %s1239_s21  ;;  %p1247_p8 = scmp.lt.s32.totalorder %s1245_s20, %s1239_s21 }
  0x2f   : > { %v671_v35 = vmul.f32 %v1475_v29, %v654_v27  ;;  %v672_v36 = vmul.f32 %v1475_v29, %v655_v28  ;;  %v544_v41 = vunpack.c.l.bf16 %v535_v14  ;;  %v545_v42 = vunpack.c.h.bf16 %v535_v14 }
  0x30   : > { %v575_v39 = vpack.c.bf16 %v560_v31, %v559_v30  ;;  %v519_v43 = vpack.c.bf16 %v504_v34, %v503_v32  ;;  %v615_v45 = vmul.f32 %v1495_v40, %v598_v33  ;;  %v616_v46 = vmul.f32 %v1495_v40, %v599_v37  ;;  %457 = vmatmul.mubr.bf16.vlgmr.msra.gmra.mrb[4].mxu1 %v1492_v38  ;;  %p1241_p5 = pnand %p1240_p4, %p1401_p9  ;;  %p1248_p10 = por %p1247_p8, %p1246_p7 }
  0x31   : > { %v687_v44 = vpack.c.bf16 %v672_v36, %v671_v35  ;;  %v561_v48 = vmul.f32 %v1472_v24, %v544_v41  ;;  %v562_v49 = vmul.f32 %v1472_v24, %v545_v42  ;;  %v488_v50 = vunpack.c.l.bf16 %v479_v16  ;;  %770 = vmatprep.mubr.bf16.mxu1 %v1463_v12  ;;  %v532_v41 = vld [vmem:[%s1450_s15 + $0x48] sm:$0xff] }
  0x32   : > { %697 = vmatprep.subr.bf16.mxu0 %v575_v39  ;;  %v489_v51 = vunpack.c.h.bf16 %v479_v16  ;;  %v631_v53 = vpack.c.bf16 %v616_v46, %v615_v45  ;;  %v656_v54 = vunpack.c.l.bf16 %v647_v21  ;;  %v657_v55 = vunpack.c.h.bf16 %v647_v21  ;;  %p1242_p6 = pneg %p1241_p5 }
  0x33   : > { %698 = vmatpush1.bf16.xpose.msra.mxu0 %v519_v43  ;;  %738 = vmatprep.subr.bf16.mxu1 %v687_v44  ;;  %v576_v58 = vpack.c.bf16 %v562_v49, %v561_v48  ;;  %v505_v59 = vmul.f32 %v1467_v18, %v488_v50  ;;  %v536_v61 = vunpack.c.l.f8e4m3fn %v531_v47  ;;  %v600_v0 = vunpack.c.l.bf16 %v591_v56  ;;  %v476_v50 = vld [vmem:[%s1450_s15 + $0x40] sm:$0xff] }
  0x34   : > { %v506_v60 = vmul.f32 %v1467_v18, %v489_v51  ;;  %v673_v62 = vmul.f32 %v1475_v29, %v656_v54  ;;  %v674_v63 = vmul.f32 %v1475_v29, %v657_v55  ;;  %v601_v1 = vunpack.c.h.bf16 %v591_v56  ;;  %739 = vmatpush1.bf16.xpose.msra.mxu1 %v631_v53  ;;  %v644_v53 = vld [vmem:[%s1450_s15 + $0x58] sm:$0xff]  ;;  %p1249_p11 = pnand %p1248_p10, %p1242_p6 }
  0x35   : > { %699 = vmatprep.subr.bf16.mxu0 %v576_v58  ;;  %v546_v3 = vunpack.c.l.bf16 %v536_v61  ;;  %v547_v4 = vunpack.c.h.bf16 %v536_v61  ;;  %v480_v5 = vunpack.c.l.f8e4m3fn %v475_v52  ;;  %v617_v10 = vmul.f32 %v1495_v40, %v600_v0 }
  0x36   : > { %v520_v2 = vpack.c.bf16 %v506_v60, %v505_v59  ;;  %v688_v9 = vpack.c.bf16 %v674_v63, %v673_v62  ;;  %v618_v11 = vmul.f32 %v1495_v40, %v601_v1  ;;  %v648_v13 = vunpack.c.l.f8e4m3fn %v643_v57 }
  0x37   : > { %v563_v14 = vmul.f32 %v1472_v24, %v546_v3  ;;  %v564_v15 = vmul.f32 %v1472_v24, %v547_v4  ;;  %v490_v16 = vunpack.c.l.bf16 %v480_v5  ;;  %v491_v17 = vunpack.c.h.bf16 %v480_v5 }
  0x38   : > { %740 = vmatprep.subr.bf16.mxu1 %v688_v9  ;;  %v632_v19 = vpack.c.bf16 %v618_v11, %v617_v10  ;;  %v658_v20 = vunpack.c.l.bf16 %v648_v13  ;;  %v659_v21 = vunpack.c.h.bf16 %v648_v13  ;;  %v592_v22 = vunpack.c.l.f8e4m3fn %v587_v8 }
  0x39   : > { %v577_v23 = vpack.c.bf16 %v564_v15, %v563_v14  ;;  %v507_v25 = vmul.f32 %v1467_v18, %v490_v16  ;;  %v508_v26 = vmul.f32 %v1467_v18, %v491_v17  ;;  %v537_v27 = vunpack.c.h.f8e4m3fn %v531_v47 }
  0x3a   : > { %v675_v12 = vmul.f32 %v1475_v29, %v658_v20  ;;  %v676_v28 = vmul.f32 %v1475_v29, %v659_v21  ;;  %v602_v30 = vunpack.c.l.bf16 %v592_v22  ;;  %v603_v31 = vunpack.c.h.bf16 %v592_v22 }
  0x3b   : > { %700 = vmatpush1.bf16.xpose.msra.mxu0 %v520_v2  ;;  %v548_v32 = vunpack.c.l.bf16 %v537_v27  ;;  %v549_v33 = vunpack.c.h.bf16 %v537_v27  ;;  %v481_v34 = vunpack.c.h.f8e4m3fn %v475_v52  ;;  %v521_v35 = vpack.c.bf16 %v508_v26, %v507_v25  ;;  %v588_v2 = vld [vmem:[%s1450_s15 + $0x50] sm:$0xff]  ;;  %v533_v27 = vld [vmem:[%s1450_s15 + $0x68] sm:$0xff] }
  0x3c   : > { %701 = vmatprep.subr.bf16.mxu0 %v577_v23  ;;  %v689_v36 = vpack.c.bf16 %v676_v28, %v675_v12  ;;  %v619_v37 = vmul.f32 %v1495_v40, %v602_v30  ;;  %v649_v39 = vunpack.c.h.f8e4m3fn %v643_v57  ;;  %741 = vmatpush1.bf16.xpose.msra.mxu1 %v632_v19  ;;  %v620_v42 = vmul.f32 %v1495_v40, %v603_v31 }
  0x3d   : > { %v565_v43 = vmul.f32 %v1472_v24, %v548_v32  ;;  %v566_v44 = vmul.f32 %v1472_v24, %v549_v33  ;;  %v492_v45 = vunpack.c.l.bf16 %v481_v34  ;;  %v493_v46 = vunpack.c.h.bf16 %v481_v34 }
  0x3e   : > { %742 = vmatprep.subr.bf16.mxu1 %v689_v36  ;;  %v660_v47 = vunpack.c.l.bf16 %v649_v39  ;;  %v661_v48 = vunpack.c.h.bf16 %v649_v39  ;;  %v593_v49 = vunpack.c.h.f8e4m3fn %v587_v8  ;;  %v538_v52 = vunpack.c.l.f8e4m3fn %v532_v41  ;;  %v645_v39 = vld [vmem:[%s1450_s15 + $0x78] sm:$0xff] }
  0x3f   : > { %v578_v51 = vpack.c.bf16 %v566_v44, %v565_v43  ;;  %v633_v58 = vpack.c.bf16 %v620_v42, %v619_v37  ;;  %v482_v61 = vunpack.c.l.f8e4m3fn %v476_v50  ;;  %v509_v62 = vmul.f32 %v1467_v18, %v492_v45 }
  0x40   : > { %v677_v54 = vmul.f32 %v1475_v29, %v660_v47  ;;  %v678_v55 = vmul.f32 %v1475_v29, %v661_v48  ;;  %v604_v56 = vunpack.c.l.bf16 %v593_v49  ;;  %v605_v57 = vunpack.c.h.bf16 %v593_v49  ;;  %v477_v49 = vld [vmem:[%s1450_s15 + $0x60] sm:$0xff] }
  0x41   : > { %v550_v59 = vunpack.c.l.bf16 %v538_v52  ;;  %v551_v60 = vunpack.c.h.bf16 %v538_v52  ;;  %v510_v63 = vmul.f32 %v1467_v18, %v493_v46  ;;  %v650_v1 = vunpack.c.l.f8e4m3fn %v644_v53 }
  0x42   : > { %v690_v0 = vpack.c.bf16 %v678_v55, %v677_v54  ;;  %v621_v3 = vmul.f32 %v1495_v40, %v604_v56  ;;  %v622_v8 = vmul.f32 %v1495_v40, %v605_v57  ;;  %v494_v9 = vunpack.c.l.bf16 %v482_v61 }
  0x43   : > { %702 = vmatpush1.bf16.xpose.msra.mxu0 %v521_v35  ;;  %v567_v4 = vmul.f32 %v1472_v24, %v550_v59  ;;  %v568_v5 = vmul.f32 %v1472_v24, %v551_v60  ;;  %v662_v10 = vunpack.c.l.bf16 %v650_v1  ;;  %v663_v11 = vunpack.c.h.bf16 %v650_v1 }
  0x44   : > { %703 = vmatprep.subr.bf16.mxu0 %v578_v51  ;;  %743 = vmatpush1.bf16.xpose.msra.mxu1 %v633_v58  ;;  %v495_v13 = vunpack.c.h.bf16 %v482_v61  ;;  %v594_v14 = vunpack.c.l.f8e4m3fn %v588_v2  ;;  %v539_v15 = vunpack.c.h.f8e4m3fn %v532_v41  ;;  %v522_v16 = vpack.c.bf16 %v510_v63, %v509_v62  ;;  %v589_v63 = vld [vmem:[%s1450_s15 + $0x70] sm:$0xff] }
  0x45   : > { %744 = vmatprep.subr.bf16.mxu1 %v690_v0  ;;  %v679_v17 = vmul.f32 %v1475_v29, %v662_v10  ;;  %v680_v19 = vmul.f32 %v1475_v29, %v663_v11  ;;  %v579_v20 = vpack.c.bf16 %v568_v5, %v567_v4  ;;  %v634_v23 = vpack.c.bf16 %v622_v8, %v621_v3 }
  0x46   : > { %v552_v21 = vunpack.c.l.bf16 %v539_v15  ;;  %v553_v22 = vunpack.c.h.bf16 %v539_v15  ;;  %v511_v25 = vmul.f32 %v1467_v18, %v494_v9  ;;  %v651_v26 = vunpack.c.h.f8e4m3fn %v644_v53 }
  0x47   : > { %v512_v12 = vmul.f32 %v1467_v18, %v495_v13  ;;  %v606_v28 = vunpack.c.l.bf16 %v594_v14  ;;  %v607_v30 = vunpack.c.h.bf16 %v594_v14  ;;  %v483_v31 = vunpack.c.h.f8e4m3fn %v476_v50 }
  0x48   : > { %v691_v32 = vpack.c.bf16 %v680_v19, %v679_v17  ;;  %v664_v33 = vunpack.c.l.bf16 %v651_v26  ;;  %v665_v34 = vunpack.c.h.bf16 %v651_v26  ;;  %v569_v35 = vmul.f32 %v1472_v24, %v552_v21 }
  0x49   : > { %v570_v36 = vmul.f32 %v1472_v24, %v553_v22  ;;  %v540_v37 = vunpack.c.l.f8e4m3fn %v533_v27  ;;  %v595_v41 = vunpack.c.h.f8e4m3fn %v588_v2  ;;  %v523_v42 = vpack.c.bf16 %v512_v12, %v511_v25 }
  0x4a   : > { %v623_v43 = vmul.f32 %v1495_v40, %v606_v28  ;;  %v624_v44 = vmul.f32 %v1495_v40, %v607_v30  ;;  %v496_v45 = vunpack.c.l.bf16 %v483_v31  ;;  %v497_v46 = vunpack.c.h.bf16 %v483_v31 }
  0x4b   : > { %704 = vmatpush1.bf16.xpose.msra.mxu0 %v522_v16  ;;  %v681_v47 = vmul.f32 %v1475_v29, %v664_v33  ;;  %v682_v48 = vmul.f32 %v1475_v29, %v665_v34  ;;  %v652_v50 = vunpack.c.l.f8e4m3fn %v645_v39  ;;  %v580_v51 = vpack.c.bf16 %v570_v36, %v569_v35 }
  0x4c   : > { %705 = vmatprep.subr.bf16.mxu0 %v579_v20  ;;  %745 = vmatpush1.bf16.xpose.msra.mxu1 %v634_v23  ;;  %v554_v52 = vunpack.c.l.bf16 %v540_v37  ;;  %v555_v53 = vunpack.c.h.bf16 %v540_v37  ;;  %v608_v54 = vunpack.c.l.bf16 %v595_v41  ;;  %v609_v55 = vunpack.c.h.bf16 %v595_v41 }
  0x4d   : > { %746 = vmatprep.subr.bf16.mxu1 %v691_v32  ;;  %v635_v56 = vpack.c.bf16 %v624_v44, %v623_v43  ;;  %v513_v57 = vmul.f32 %v1467_v18, %v496_v45  ;;  %v484_v58 = vunpack.c.l.f8e4m3fn %v477_v49  ;;  %v514_v59 = vmul.f32 %v1467_v18, %v497_v46 }
  0x4e   : > { %v692_v60 = vpack.c.bf16 %v682_v48, %v681_v47  ;;  %v666_v61 = vunpack.c.l.bf16 %v652_v50  ;;  %v667_v62 = vunpack.c.h.bf16 %v652_v50  ;;  %v571_v0 = vmul.f32 %v1472_v24, %v554_v52  ;;  %v1219_v50 = vld [vmem:[%s1484_s28] sm:$0xff]   ;;  %v1221_v52 = vld [vmem:[%s1484_s28 + $0x10] sm:$0xff]  }
  0x4f   : > { %v572_v1 = vmul.f32 %v1472_v24, %v555_v53  ;;  %v541_v2 = vunpack.c.h.f8e4m3fn %v533_v27  ;;  %v625_v3 = vmul.f32 %v1495_v40, %v608_v54  ;;  %v626_v4 = vmul.f32 %v1495_v40, %v609_v55 }
  0x50   : > { %v498_v5 = vunpack.c.l.bf16 %v484_v58  ;;  %v499_v8 = vunpack.c.h.bf16 %v484_v58  ;;  %v596_v9 = vunpack.c.l.f8e4m3fn %v589_v63  ;;  %v524_v10 = vpack.c.bf16 %v514_v59, %v513_v57  ;;  %v1225_v58 = vld [vmem:[%s1484_s28 + $0x30] sm:$0xff]  }
  0x51   : > { %v683_v11 = vmul.f32 %v1475_v29, %v666_v61  ;;  %v684_v13 = vmul.f32 %v1475_v29, %v667_v62  ;;  %v653_v14 = vunpack.c.h.f8e4m3fn %v645_v39  ;;  %v581_v15 = vpack.c.bf16 %v572_v1, %v571_v0 }
  0x52   : > { %v556_v16 = vunpack.c.l.bf16 %v541_v2  ;;  %v557_v17 = vunpack.c.h.bf16 %v541_v2  ;;  %v636_v19 = vpack.c.bf16 %v626_v4, %v625_v3  ;;  %v515_v20 = vmul.f32 %v1467_v18, %v498_v5  ;;  %v345_v2 = vld [vmem:[#allocation3] sm:$0xff] }
  0x53   : > { %706 = vmatpush1.bf16.xpose.msra.mxu0 %v523_v42  ;;  %v516_v21 = vmul.f32 %v1467_v18, %v499_v8  ;;  %v610_v22 = vunpack.c.l.bf16 %v596_v9  ;;  %v611_v23 = vunpack.c.h.bf16 %v596_v9  ;;  %v693_v25 = vpack.c.bf16 %v684_v13, %v683_v11  ;;  %v346_v8 = vld [vmem:[#allocation3 + $0x8] sm:$0xff] }
  0x54   : > { %707 = vmatprep.subr.bf16.mxu0 %v580_v51  ;;  %747 = vmatpush1.bf16.xpose.msra.mxu1 %v635_v56  ;;  %v485_v26 = vunpack.c.h.f8e4m3fn %v477_v49  ;;  %v668_v27 = vunpack.c.l.bf16 %v653_v14  ;;  %v669_v12 = vunpack.c.h.bf16 %v653_v14  ;;  %v573_v28 = vmul.f32 %v1472_v24, %v556_v16  ;;  %v1220_v51 = vld [vmem:[%s1484_s28 + $0x8] sm:$0xff]  }
  0x55   : > { %748 = vmatprep.subr.bf16.mxu1 %v692_v60  ;;  %v574_v30 = vmul.f32 %v1472_v24, %v557_v17  ;;  %v525_v31 = vpack.c.bf16 %v516_v21, %v515_v20  ;;  %v627_v32 = vmul.f32 %v1495_v40, %v610_v22  ;;  %v628_v33 = vmul.f32 %v1495_v40, %v611_v23  ;;  %v1224_v56 = vld [vmem:[%s1484_s28 + $0x28] sm:$0xff]   ;;  %v1226_v60 = vld [vmem:[%s1484_s28 + $0x38] sm:$0xff]  }
  0x56   : > { %v597_v34 = vunpack.c.h.f8e4m3fn %v589_v63  ;;  %v500_v35 = vunpack.c.l.bf16 %v485_v26  ;;  %v501_v36 = vunpack.c.h.bf16 %v485_v26  ;;  %v685_v37 = vmul.f32 %v1475_v29, %v668_v27 }
  0x57   : > { %v686_v39 = vmul.f32 %v1475_v29, %v669_v12  ;;  %v582_v41 = vpack.c.bf16 %v574_v30, %v573_v28  ;;  %v637_v42 = vpack.c.bf16 %v628_v33, %v627_v32  ;;  %v857_v53 = vsel %vm338_vm0, %v1221_v52, 0 }
  0x58   : > { %v612_v43 = vunpack.c.l.bf16 %v597_v34  ;;  %v613_v44 = vunpack.c.h.bf16 %v597_v34  ;;  %v517_v24 = vmul.f32 %v1467_v18, %v500_v35  ;;  %v518_v45 = vmul.f32 %v1467_v18, %v501_v36 }
  0x59   : > { %v694_v46 = vpack.c.bf16 %v686_v39, %v685_v37  ;;  %v851_v18 = vsel %vm338_vm0, %v1219_v50, 0  ;;  %v866_v57 = vsel %vm338_vm0, %v1224_v56, 0  ;;  %v869_v59 = vsel %vm338_vm0, %v1225_v58, 0 }
  0x5a   : > { %v629_v47 = vmul.f32 %v1495_v40, %v612_v43  ;;  %v630_v48 = vmul.f32 %v1495_v40, %v613_v44  ;;  %v526_v49 = vpack.c.bf16 %v518_v45, %v517_v24  ;;  %v854_v40 = vsel %vm338_vm0, %v1220_v51, 0 }
  0x5b   : > { %708 = vmatpush1.bf16.xpose.msra.mxu0 %v524_v10  ;;  %v872_v61 = vsel %vm338_vm0, %v1226_v60, 0 }
  0x5c   : > { %709 = vmatprep.subr.bf16.mxu0 %v581_v15  ;;  %749 = vmatpush1.bf16.xpose.msra.mxu1 %v636_v19  ;;  %v638_v29 = vpack.c.bf16 %v630_v48, %v629_v47 }
  0x5d   : > { %750 = vmatprep.subr.bf16.mxu1 %v693_v25 }
  0x63   : > { %710 = vmatpush1.bf16.xpose.msra.mxu0 %v525_v31 }
  0x64   : > { %711 = vmatprep.subr.bf16.mxu0 %v582_v41  ;;  %751 = vmatpush1.bf16.xpose.msra.mxu1 %v637_v42 }
  0x65   : > { %752 = vmatprep.subr.bf16.mxu1 %v694_v46 }
  0x6b   : > { %712 = vmatpush1.bf16.xpose.msra.mxu0 %v526_v49 }
  0x6c   : > { %1128 = vmatprep.subr.bf16.mxu0 %v1322_v6  ;;  %753 = vmatpush1.bf16.xpose.msra.mxu1 %v638_v29 }
  0x72   : > { %730 = vmatmul.mubr.bf16.vlgmr.msra.gmra.mrb[0].mxu0 %v1445_v7  ;;  %v1222_v7 = vld [vmem:[%s1484_s28 + $0x18] sm:$0xff]  }
  0x73   : > { %1129 = vmatpush3.bf16.xpose.msra.mxu0 %v851_v18  ;;  %771 = vmatmul.mubr.bf16.vlgmr.msra.gmra.mrb[8].mxu1 %v1492_v38  ;;  %v860_v54 = vsel %vm338_vm0, %v1222_v7, 0  ;;  %v1223_v38 = vld [vmem:[%s1484_s28 + $0x20] sm:$0xff]  }
  0x74   : > { %1130 = vmatprep.subr.bf16.mxu0 %v1322_v6  ;;  %v863_v55 = vsel %vm338_vm0, %v1223_v38, 0  ;;  %1144 = vmatprep.mubr.msk.bf16.mxu0 %vm1323_vm1, %v1322_v6 }
  0x7b   : > { %1131 = vmatpush3.bf16.xpose.msra.mxu0 %v854_v40 }
  0x7c   : > { %1132 = vmatprep.subr.bf16.mxu0 %v1322_v6 }
  0x83   : > { %1133 = vmatpush3.bf16.xpose.msra.mxu0 %v857_v53 }
  0x84   : > { %1134 = vmatprep.subr.bf16.mxu0 %v1322_v6 }
  0x8b   : > { %1135 = vmatpush3.bf16.xpose.msra.mxu0 %v860_v54 }
  0x8c   : > { %1136 = vmatprep.subr.bf16.mxu0 %v1322_v6 }
  0x93   : > { %1137 = vmatpush3.bf16.xpose.msra.mxu0 %v863_v55 }
  0x94   : > { %1138 = vmatprep.subr.bf16.mxu0 %v1322_v6 }
  0x9b   : > { %1139 = vmatpush3.bf16.xpose.msra.mxu0 %v866_v57 }
  0x9c   : > { %1140 = vmatprep.subr.bf16.mxu0 %v1322_v6 }
  0xa3   : > { %1141 = vmatpush3.bf16.xpose.msra.mxu0 %v869_v59 }
  0xa4   : > { %1142 = vmatprep.subr.bf16.mxu0 %v1322_v6 }
  0xab   : > { %1143 = vmatpush3.bf16.xpose.msra.mxu0 %v872_v61 }
  0xfb   : > { %v417_v62 = vpop.f32.mrb[0].mxu1 }
  0xfc   : > { %v419_v63 = vpop.f32.mrb[1].mxu1 }
  0xfd   : > { %v420_v0 = vpop.f32.mrb[2].mxu1 }
  0xfe   : > { %v422_v1 = vpop.f32.mrb[3].mxu1 }
 0x103   : > { %v458_v3 = vpop.f32.mrb[4].mxu1 }
 0x104   : > { %v459_v4 = vadd.f32 %v458_v3, %v417_v62  ;;  %v460_v5 = vpop.f32.mrb[5].mxu1 }
 0x105   : > { %v461_v9 = vpop.f32.mrb[6].mxu1 }
 0x106   : > { %v465_v10 = vadd.f32 %v459_v4, %v345_v2  ;;  %v462_v11 = vadd.f32 %v461_v9, %v420_v0  ;;  %v463_v13 = vpop.f32.mrb[7].mxu1 }
 0x108   : > { %468 = vst.msk [vmem:[#allocation3] sm:$0xff] %vm338_vm0, %v465_v10  ;;  %v466_v6 = vadd.f32 %v462_v11, %v346_v8 }
 0x10a   : > { %469 = vst.msk [vmem:[#allocation3 + $0x8] sm:$0xff] %vm338_vm0, %v466_v6 }
 0x10f   : > { %v788_v14 = vld [vmem:[#allocation3] sm:$0xff] }
 0x111   : > { %v789_v15 = vld [vmem:[#allocation3 + $0x8] sm:$0xff] }
 0x112   : > { %v790_v16 = vpack.c.bf16 %v789_v15, %v788_v14 }
 0x114   : > { %1145 = vmatmul.mubr.msk.bf16.vlgmr.msra.gmra.mrb[4].mxu0 %vm338_vm0, %v790_v16 }
 0x145   : > { %v731_v17 = vpop.f32.mrb[0].mxu0 }
 0x146   : > { %v733_v19 = vpop.f32.mrb[1].mxu0  ;;  %v772_v21 = vpop.f32.mrb[8].mxu1 }
 0x147   : > { %v734_v20 = vpop.f32.mrb[2].mxu0  ;;  %v773_v23 = vadd.f32 %v772_v21, %v731_v17  ;;  %v774_v25 = vpop.f32.mrb[9].mxu1 }
 0x148   : > { %v736_v22 = vpop.f32.mrb[3].mxu0  ;;  %v775_v26 = vpop.f32.mrb[10].mxu1 }
 0x149   : > { %v776_v27 = vadd.f32 %v775_v26, %v734_v20  ;;  %v777_v12 = vpop.f32.mrb[11].mxu1 }
 0x1e7   : > { %v908_v28 = vpop.f32.mrb[4].mxu0 }
 0x1e8   : > { %v915_v30 = vmul.f32 2.0, %v908_v28  ;;  %v1146_v31 = vpop.f32.mrb[5].mxu0 }
 0x1e9   : > { %v911_v32 = vpop.f32.mrb[6].mxu0 }
 0x1ea   : > { %v917_v33 = vadd.f32 %v915_v30, %v773_v23  ;;  %v916_v34 = vmul.f32 2.0, %v911_v32  ;;  %v1147_v35 = vpop.f32.mrb[7].mxu0 }
 0x1ec   : > { %v918_v36 = vadd.f32 %v916_v34, %v776_v27 }
 0x1ee   : > { %v1117_v37 = vpack.c.bf16 %v918_v36, %v917_v33 }
 0x1f0   : > { %1118 = vst [vmem:[%s293_s11] sm:$0xff] %v1117_v37  }
 0x1f1   : > { %1252 = shalt.err (!%p1249_p11)
}
 0x1f2   : > { %s1253_s22 = scalar_lea.hbm %s1606_s17, 128  ;;  %s1257_s29 = scalar_lea.hbm %s1659_s5, 256 }
 0x1f3   : > { %p1254_p12 = scmp.ne.s32.totalorder %s1606_s17, %s1253_s22  ;;  %p1258_p2 = scmp.lt.u32.totalorder %s1606_s17, %s1659_s5 }
 0x1f4   : > { %p1259_p3 = scmp.lt.u32.totalorder %s1257_s29, %s1253_s22  ;;  %p1261_p5 = scmp.lt.u32.totalorder %s1253_s22, %s1606_s17 }
 0x1f5   : > { %p1255_p0 = pnand %p1254_p12, %p1401_p9 }
 0x1f6   : > { %p1260_p4 = por %p1259_p3, %p1258_p2 }
 0x1f7   : > { %p1256_p1 = pneg %p1255_p0 }
 0x1f8   : > { %p1262_p6 = por %p1261_p5, %p1260_p4 }
 0x1fa   : > { %p1263_p7 = pnand %p1262_p6, %p1256_p1 }
 0x1fc   : > { %1266 = shalt.err (!%p1263_p7)
}
 0x1fd   : > { %s1325_s11 = smov 64   ;;  %s1326_s14 = smov 128  }
 0x1fe   : > { %s1327_s15 = smov 4  }
 0x1ff   : > { %1148 = dma.vmem_to_hbm [thread:$0]  (%p1401_p9), %s1601_s12, 128, %s1606_s17, %s1608_s19, %s1325_s11, %s1326_s14, %s1327_s15  }
 0x200 PF: > { %p1154_p8 = scmp.ge.s32.totalorder %s1319_s27, 2  ;;  %s960_s16 = sand.u32 1, %s1299_s23  }
 0x201   : > { %s961_s21 = scalar_lea.sflag [#allocation7], %s960_s16 }
 0x202   : > { %p1151_p10 = pnand %p1154_p8, %p1408_p13 }
 0x204   : > { %1294 = dma.done.wait (!%p1151_p10), %s961_s21, 128  }
 0x205   : > { %1296 = vsyncadd (!%p1151_p10), %s961_s21, 4294967168  ;;  %s24_s27 = sadd.s32 1, %s1319_s27   ;;  %s1662_s23 = smov %s1303_s24 }
 0x206   : > { %p21_p11 = scmp.ge.s32.totalorder %s24_s27, 4   ;;  %s1663_s24 = smov %s1307_s0 }
 0x207   : > { %s1664_s0 = smov %s1414_s10  ;;  %s1665_s25 = smov %s1315_s26 }
 0x208   : > { %s1666_s26 = smov %s1668_s30  ;;  %23 = sbr.rel (!%p21_p11) target bundleno = 19 (0x13), region = 88 }
 0x20f   :  { %966 = vsyncpa [#allocation7], 1 }
 0x210   :  { %968 = vsyncpa [#allocation7 + $0x1], 1 }

// kernel: mlp_forward.2
= control target key start
LH: loop header
LB: loop body
LE: loop exit
PB: predicated region body
PF: predicated region fallthrough
CT: control target
= control target key end

     0   :  { %s2518_s0 = inlined_call_operand.vmem [shape: f32[8], index: 0, kind: input, shape index: {}]   ;;  %s2519_s2 = inlined_call_operand.vmem [shape: bf16[16,256], index: 2, kind: input, shape index: {}]   ;;  %s2520_s3 = inlined_call_operand.vmem [shape: f8e4m3fn[512,256], index: 3, kind: input, shape index: {}]   ;;  %s2521_s4 = inlined_call_operand.vmem [shape: f8e4m3fn[512,256], index: 4, kind: input, shape index: {}]   ;;  %s2522_s5 = inlined_call_operand.vmem [shape: bf16[16,256], index: 5, kind: input, shape index: {}]   ;;  %s2523_s6 = inlined_call_operand.vmem [shape: bf16[512,16], index: 6, kind: input, shape index: {}]   ;;  %s2524_s7 = inlined_call_operand.vmem [shape: bf16[512,16], index: 7, kind: input, shape index: {}]   ;;  %s2525_s8 = inlined_call_operand.vmem [shape: bf16[16,512], index: 8, kind: output, shape index: {}]   ;;  %s2526_s1 = inlined_call_operand.vmem [shape: f32[8], index: 1, kind: input, shape index: {}]  }
   0x1   :  { %s13_s29 = sshll.u32 %s2518_s0, 4  ;;  %s17_s10 = sshll.u32 %s2526_s1, 4  ;;  %s14_s29 = int_to_ptr.vmem [resolvable:$true] %s13_s29  ;;  %s18_s10 = int_to_ptr.vmem [resolvable:$true] %s17_s10 }
   0x2   :  { %s2001_s11 = scalar_lea.vmem %s14_s29, 16  ;;  %p2006_p1 = scmp.lt.s32.totalorder %s14_s29, %s14_s29 }
   0x3   :  { %p2002_p0 = scmp.ne.s32.totalorder %s14_s29, %s2001_s11  ;;  %p2007_p2 = scmp.lt.s32.totalorder %s2001_s11, %s2001_s11 }
   0x5   :  { %p2008_p3 = por %p2007_p2, %p2006_p1 }
   0x7   :  { %p2009_p4 = pnand %p2008_p3, %p2002_p0 }
   0x9   :  { %2012 = shalt.err (!%p2009_p4)  }
   0xa   :  { %s2067_s12 = smov [#allocation6]   ;;  %s2013_s13 = scalar_lea.vmem %s18_s10, 16 }
   0xb   :  { %16 = dma.vmem_to_smem %s14_s29, 16, %s2067_s12, [#allocation5] }
   0xc   :  { %p2014_p5 = scmp.ne.s32.totalorder %s18_s10, %s2013_s13  ;;  %p2018_p6 = scmp.lt.s32.totalorder %s18_s10, %s18_s10 }
   0xd   :  { %p2019_p7 = scmp.lt.s32.totalorder %s2013_s13, %s2013_s13 }
   0xf   :  { %p2020_p8 = por %p2019_p7, %p2018_p6 }
  0x11   :  { %p2021_p9 = pnand %p2020_p8, %p2014_p5 }
  0x13   :  { %2024 = shalt.err (!%p2021_p9)  }
  0x14   :  { %s2068_s0 = smov [#allocation7]  }
  0x15   :  { %20 = dma.vmem_to_smem %s18_s10, 16, %s2068_s0, [#allocation5] }
  0x16   :  { %2045 = dma.done.wait [#allocation5], 32 }
  0x17   :  { %2046 = vsyncadd [#allocation5], 4294967264 }
  0x18   :  { %22 = sfence }
  0x19   :  { %s2121_s1 = smov 0   ;;  %s2123_s14 = smov 0  }
  0x1a   :  { %s2125_s15 = smov 0   ;;  %s2127_s16 = smov 0  }
  0x1b   :  { %s2129_s17 = smov 0  }
  0x1c LB: > { %s1773_s18 = sadd.s32 4294967295, %s2065_s17   ;;  %s43_s19 = sadd.s32 1, %s2061_s16  ;;  %s2065_s17 = sphi %s2129_s17, %s28_s17   ;;  %s2061_s16 = sphi %s2127_s16, %s2531_s16   ;;  %s2057_s15 = sphi %s2125_s15, %s2530_s15   ;;  %s2053_s14 = sphi %s2123_s14, %s2529_s14   ;;  %s2049_s1 = sphi %s2121_s1, %s2528_s1  }
  0x1d   : > { %p45_p10 = scmp.ge.s32.totalorder %s43_s19, 2  ;;  %s218_s20 = sadd.s32 1, %s2053_s14 }
  0x1e   : > { %p228_p11 = scmp.ne.s32.totalorder %s2053_s14, %s2049_s1  ;;  %p229_p12 = scmp.eq.s32.totalorder %s1773_s18, 1 }
  0x1f   : > { %s2533_s19 = smov (%p45_p10, %s43_s19), 0  ;;  %p1779_p0 = scmp.ge.s32.totalorder %s2065_s17, 1 }
  0x20   : > { %p2153_p13 = por %p229_p12, %p228_p11  ;;  %s214_s22 = ssub.s32 %s2061_s16, %s2533_s19 }
  0x21   : > { %p325_p1 = scmp.lt.s32.totalorder %s2065_s17, 3  ;;  %p216_p2 = scmp.eq.s32.totalorder %s214_s22, 0 }
  0x23   : > { %p326_p3 = pnand %p1779_p0, %p325_p1 }
  0x24   : > { %s2162_s23 = scalar_select %p216_p2, %s2053_s14, %s218_s20  }
  0x25   : > { %329 = sbr.rel (%p326_p3) target bundleno = 533 (0x215), region = 44  ;;  %v1946_v0 = vld [vmem:[%s2522_s5 + $0x4] ss:$8 sps:$4 sm:$0xff] (!%p326_p3)   ;;  %s2168_s26 = sshll.u32 (!%p326_p3), %s2057_s15, 3  ;;  %v1948_v1 = vld [vmem:[%s2522_s5] ss:$8 sps:$4 sm:$0xff] (!%p326_p3)  }
  0x26   : > { %s2171_s27 = sshll.u32 (!%p326_p3), %s2057_s15, 2  ;;  %p408_p4 = scmp.lt.s32.totalorder (!%p326_p3), %s2168_s26, 15  ;;  %492 = vmatprep.subr.bf16.mxu0 (!%p326_p3), %v1946_v0  ;;  %v1949_v2 = vld [vmem:[%s2519_s2 + $0x4] ss:$8 sps:$4 sm:$0xff] (!%p326_p3)   ;;  %v1951_v3 = vld [vmem:[%s2519_s2] ss:$8 sps:$4 sm:$0xff] (!%p326_p3)  }
  0x27   : > { %s596_s30 = sadd.s32 (!%p326_p3), 1, %s2171_s27  ;;  %493 = vmatpush1.bf16.xpose.msra.mxu0 (!%p326_p3), %v1948_v1  ;;  %524 = vmatprep.mubr.bf16.mxu0 (!%p326_p3), %v1949_v2  ;;  %s541_s0 = sld [smem:[#allocation6 + %s2171_s27]] (!%p326_p3)  ;;  %vm463_vm0 = vcmask (!%p326_p3), 130048  }
  0x28   : > { %s597_s11 = sld [smem:[#allocation6 + %s596_s30]] (!%p326_p3)  ;;  %800 = vmatprep.mubr.bf16.mxu1 (!%p326_p3), %v1949_v2  ;;  %s2290_s24 = sadd.s32 (!%p326_p3), 2, %s2171_s27 }
  0x29   : > { %s873_s12 = sld [smem:[#allocation7 + %s596_s30]] (!%p326_p3) }
  0x2a   : > { %s2184_s20 = sld [smem:[#allocation7 + %s2171_s27]] (!%p326_p3)  ;;  %s709_s27 = sadd.s32 (!%p326_p3), 1, %s2290_s24 }
  0x2b   : > { %s2301_s25 = sld [smem:[#allocation6 + %s709_s27]] (!%p326_p3) }
  0x2c   : > { %s409_s13 = scalar_select %p408_p4, %s2168_s26, 15 }
  0x2d   : > { %v2207_v20 = vstv %s541_s0  ;;  %s2307_s28 = sld [smem:[#allocation7 + %s709_s27]] }
  0x2e   : > { %s1843_s18 = sshll.u32 %s409_s13, 4  ;;  %v2202_v9 = vstv %s597_s11  ;;  %525 = vmatmul.mubr.bf16.vlgmr.msra.gmra.mrb[0].mxu0 %v1951_v3  ;;  %s1787_s11 = sshll.u32 %s2057_s15, 5 }
  0x2f   : > { %s2192_s29 = scalar_lea.vmem %s2520_s3, %s1843_s18  ;;  %s2197_s30 = scalar_lea.vmem %s2521_s4, %s1843_s18  ;;  %v2205_v14 = vstv %s873_s12  ;;  %1071 = vmatprep.mubr.bf16.mxu0 %v1949_v2 }
  0x30   : > { %v598_v4 = vld [vmem:[%s2192_s29 + $0x8] sm:$0xff]  ;;  %v542_v5 = vld [vmem:[%s2192_s29] sm:$0xff]  ;;  %v2216_v31 = vstv %s2184_s20  ;;  %v599_v36 = vld [vmem:[%s2192_s29 + $0x18] sm:$0xff]  ;;  %p437_p5 = scmp.lt.s32.totalorder %s1787_s11, 63  ;;  %s2318_s9 = sld [smem:[#allocation6 + %s2290_s24]] }
  0x31   : > { %v874_v6 = vld [vmem:[%s2197_s30 + $0x8] sm:$0xff]  ;;  %v602_v7 = vunpack.c.l.f8e4m3fn %v598_v4  ;;  %v603_v8 = vunpack.c.h.f8e4m3fn %v598_v4  ;;  %v546_v10 = vunpack.c.l.f8e4m3fn %v542_v5  ;;  %v820_v11 = vld [vmem:[%s2197_s30] sm:$0xff]  ;;  %v547_v12 = vunpack.c.h.f8e4m3fn %v542_v5  ;;  %v543_v53 = vld [vmem:[%s2192_s29 + $0x10] sm:$0xff]  ;;  %s2325_s10 = sld [smem:[#allocation7 + %s2290_s24]] }
  0x32   : > { %v878_v13 = vunpack.c.l.f8e4m3fn %v874_v6  ;;  %v824_v15 = vunpack.c.l.f8e4m3fn %v820_v11  ;;  %v879_v43 = vunpack.c.h.f8e4m3fn %v874_v6  ;;  %v825_v44 = vunpack.c.h.f8e4m3fn %v820_v11  ;;  %v875_v58 = vld [vmem:[%s2197_s30 + $0x18] sm:$0xff]  ;;  %v821_v59 = vld [vmem:[%s2197_s30 + $0x10] sm:$0xff]  ;;  %s2535_s11 = smov (!%p437_p5, %s1787_s11), 63 }
  0x33   : > { %v610_v16 = vunpack.c.l.bf16 %v602_v7  ;;  %v611_v17 = vunpack.c.h.bf16 %v602_v7  ;;  %v554_v18 = vunpack.c.l.bf16 %v546_v10  ;;  %v555_v19 = vunpack.c.h.bf16 %v546_v10  ;;  %s1788_s15 = sshll.u32 %s2535_s11, 2  ;;  %s391_s11 = sand.u32 1, %s2049_s1  }
  0x34   : > { %v886_v21 = vunpack.c.l.bf16 %v878_v13  ;;  %v887_v22 = vunpack.c.h.bf16 %v878_v13  ;;  %v832_v23 = vunpack.c.l.bf16 %v824_v15  ;;  %v833_v30 = vunpack.c.h.bf16 %v824_v15  ;;  %s2238_s0 = scalar_lea.vmem %s2523_s6, %s1788_s15  ;;  %s2243_s22 = scalar_lea.vmem %s2524_s7, %s1788_s15 }
  0x35   : > { %v627_v24 = vmul.f32 %v2202_v9, %v610_v16  ;;  %v628_v25 = vmul.f32 %v2202_v9, %v611_v17  ;;  %v571_v26 = vmul.f32 %v2207_v20, %v554_v18  ;;  %v572_v27 = vmul.f32 %v2207_v20, %v555_v19  ;;  %s1780_s15 = sshll.u32 %s391_s11, 4 }
  0x36   : > { %v903_v28 = vmul.f32 %v2205_v14, %v886_v21  ;;  %v904_v29 = vmul.f32 %v2205_v14, %v887_v22  ;;  %v849_v34 = vmul.f32 %v2216_v31, %v832_v23  ;;  %v612_v35 = vunpack.c.l.bf16 %v603_v8  ;;  %s393_s12 = scalar_lea.vmem [#allocation8], %s1780_s15 }
  0x37   : > { %v643_v32 = vpack.c.bf16 %v628_v25, %v627_v24  ;;  %v587_v33 = vpack.c.bf16 %v572_v27, %v571_v26  ;;  %v850_v38 = vmul.f32 %v2216_v31, %v833_v30  ;;  %v613_v39 = vunpack.c.h.bf16 %v603_v8  ;;  %v600_v27 = vld [vmem:[%s2192_s29 + $0x28] sm:$0xff] }
  0x38   : > { %v919_v37 = vpack.c.bf16 %v904_v29, %v903_v28  ;;  %v556_v40 = vunpack.c.l.bf16 %v547_v12  ;;  %v629_v41 = vmul.f32 %v2202_v9, %v612_v35  ;;  %v557_v42 = vunpack.c.h.bf16 %v547_v12 }
  0x39   : > { %768 = vmatprep.subr.bf16.mxu1 %v643_v32  ;;  %v865_v45 = vpack.c.bf16 %v850_v38, %v849_v34  ;;  %v630_v46 = vmul.f32 %v2202_v9, %v613_v39  ;;  %v604_v48 = vunpack.c.l.f8e4m3fn %v599_v36  ;;  %v888_v50 = vunpack.c.l.bf16 %v879_v43 }
  0x3a   : > { %769 = vmatpush1.bf16.xpose.msra.mxu1 %v587_v33  ;;  %1039 = vmatprep.subr.bf16.mxu0 %v919_v37  ;;  %v573_v47 = vmul.f32 %v2207_v20, %v556_v40  ;;  %v574_v49 = vmul.f32 %v2207_v20, %v557_v42  ;;  %v889_v51 = vunpack.c.h.bf16 %v879_v43  ;;  %v834_v52 = vunpack.c.l.bf16 %v825_v44  ;;  %v544_v43 = vld [vmem:[%s2192_s29 + $0x20] sm:$0xff] }
  0x3b   : > { %1040 = vmatpush1.bf16.xpose.msra.mxu0 %v865_v45  ;;  %v644_v54 = vpack.c.bf16 %v630_v46, %v629_v41  ;;  %v835_v55 = vunpack.c.h.bf16 %v825_v44  ;;  %v614_v56 = vunpack.c.l.bf16 %v604_v48  ;;  %v615_v57 = vunpack.c.h.bf16 %v604_v48  ;;  %v876_v48 = vld [vmem:[%s2197_s30 + $0x28] sm:$0xff] }
  0x3c   : > { %v588_v60 = vpack.c.bf16 %v574_v49, %v573_v47  ;;  %v905_v61 = vmul.f32 %v2205_v14, %v888_v50  ;;  %v906_v62 = vmul.f32 %v2205_v14, %v889_v51  ;;  %v851_v63 = vmul.f32 %v2216_v31, %v834_v52  ;;  %v822_v51 = vld [vmem:[%s2197_s30 + $0x20] sm:$0xff] }
  0x3d   : > { %770 = vmatprep.subr.bf16.mxu1 %v644_v54  ;;  %v852_v0 = vmul.f32 %v2216_v31, %v835_v55  ;;  %v631_v1 = vmul.f32 %v2202_v9, %v614_v56  ;;  %v632_v2 = vmul.f32 %v2202_v9, %v615_v57  ;;  %v548_v3 = vunpack.c.l.f8e4m3fn %v543_v53 }
  0x3e   : > { %v920_v4 = vpack.c.bf16 %v906_v62, %v905_v61  ;;  %v880_v5 = vunpack.c.l.f8e4m3fn %v875_v58  ;;  %v826_v6 = vunpack.c.l.f8e4m3fn %v821_v59  ;;  %v605_v7 = vunpack.c.h.f8e4m3fn %v599_v36 }
  0x3f   : > { %v866_v8 = vpack.c.bf16 %v852_v0, %v851_v63  ;;  %v645_v10 = vpack.c.bf16 %v632_v2, %v631_v1  ;;  %v558_v11 = vunpack.c.l.bf16 %v548_v3  ;;  %v559_v12 = vunpack.c.h.bf16 %v548_v3 }
  0x40   : > { %1041 = vmatprep.subr.bf16.mxu0 %v920_v4  ;;  %v890_v13 = vunpack.c.l.bf16 %v880_v5  ;;  %v891_v15 = vunpack.c.h.bf16 %v880_v5  ;;  %v836_v16 = vunpack.c.l.bf16 %v826_v6  ;;  %v837_v17 = vunpack.c.h.bf16 %v826_v6  ;;  %v2266_v5 = vld [vmem:[%s2192_s29 + $0x38] sm:$0xff] }
  0x41   : > { %v575_v18 = vmul.f32 %v2207_v20, %v558_v11  ;;  %v576_v19 = vmul.f32 %v2207_v20, %v559_v12  ;;  %v616_v21 = vunpack.c.l.bf16 %v605_v7  ;;  %v617_v22 = vunpack.c.h.bf16 %v605_v7 }
  0x42   : > { %771 = vmatpush1.bf16.xpose.msra.mxu1 %v588_v60  ;;  %v907_v23 = vmul.f32 %v2205_v14, %v890_v13  ;;  %v908_v24 = vmul.f32 %v2205_v14, %v891_v15  ;;  %v853_v25 = vmul.f32 %v2216_v31, %v836_v16  ;;  %v854_v26 = vmul.f32 %v2216_v31, %v837_v17 }
  0x43   : > { %772 = vmatprep.subr.bf16.mxu1 %v645_v10  ;;  %1042 = vmatpush1.bf16.xpose.msra.mxu0 %v866_v8  ;;  %v633_v28 = vmul.f32 %v2202_v9, %v616_v21  ;;  %v634_v29 = vmul.f32 %v2202_v9, %v617_v22  ;;  %v549_v30 = vunpack.c.h.f8e4m3fn %v543_v53  ;;  %v881_v33 = vunpack.c.h.f8e4m3fn %v875_v58 }
  0x44   : > { %v921_v32 = vpack.c.bf16 %v908_v24, %v907_v23  ;;  %v827_v34 = vunpack.c.h.f8e4m3fn %v821_v59  ;;  %v589_v35 = vpack.c.bf16 %v576_v19, %v575_v18  ;;  %v606_v38 = vunpack.c.l.f8e4m3fn %v600_v27 }
  0x45   : > { %v560_v36 = vunpack.c.l.bf16 %v549_v30  ;;  %v561_v37 = vunpack.c.h.bf16 %v549_v30  ;;  %v867_v39 = vpack.c.bf16 %v854_v26, %v853_v25  ;;  %v646_v40 = vpack.c.bf16 %v634_v29, %v633_v28  ;;  %v877_v29 = vld [vmem:[%s2197_s30 + $0x38] sm:$0xff] }
  0x46   : > { %1043 = vmatprep.subr.bf16.mxu0 %v921_v32  ;;  %v892_v41 = vunpack.c.l.bf16 %v881_v33  ;;  %v893_v42 = vunpack.c.h.bf16 %v881_v33  ;;  %v838_v44 = vunpack.c.l.bf16 %v827_v34  ;;  %v839_v45 = vunpack.c.h.bf16 %v827_v34  ;;  %v2281_v33 = vld [vmem:[%s2192_s29 + $0x30] sm:$0xff] }
  0x47   : > { %v618_v46 = vunpack.c.l.bf16 %v606_v38  ;;  %v619_v47 = vunpack.c.h.bf16 %v606_v38  ;;  %v577_v52 = vmul.f32 %v2207_v20, %v560_v36  ;;  %v578_v53 = vmul.f32 %v2207_v20, %v561_v37 }
  0x48   : > { %v909_v49 = vmul.f32 %v2205_v14, %v892_v41  ;;  %v910_v50 = vmul.f32 %v2205_v14, %v893_v42  ;;  %v550_v54 = vunpack.c.l.f8e4m3fn %v544_v43  ;;  %v882_v58 = vunpack.c.l.f8e4m3fn %v876_v48  ;;  %v2284_v41 = vld [vmem:[%s2197_s30 + $0x30] sm:$0xff] }
  0x49   : > { %v635_v56 = vmul.f32 %v2202_v9, %v618_v46  ;;  %v636_v57 = vmul.f32 %v2202_v9, %v619_v47  ;;  %v855_v59 = vmul.f32 %v2216_v31, %v838_v44  ;;  %v856_v60 = vmul.f32 %v2216_v31, %v839_v45 }
  0x4a   : > { %773 = vmatpush1.bf16.xpose.msra.mxu1 %v589_v35  ;;  %v922_v55 = vpack.c.bf16 %v910_v50, %v909_v49  ;;  %v828_v61 = vunpack.c.l.f8e4m3fn %v822_v51  ;;  %v607_v62 = vunpack.c.h.f8e4m3fn %v600_v27  ;;  %v894_v63 = vunpack.c.l.bf16 %v882_v58 }
  0x4b   : > { %774 = vmatprep.subr.bf16.mxu1 %v646_v40  ;;  %1044 = vmatpush1.bf16.xpose.msra.mxu0 %v867_v39  ;;  %v895_v0 = vunpack.c.h.bf16 %v882_v58  ;;  %v590_v1 = vpack.c.bf16 %v578_v53, %v577_v52  ;;  %v562_v2 = vunpack.c.l.bf16 %v550_v54  ;;  %v563_v3 = vunpack.c.h.bf16 %v550_v54 }
  0x4c   : > { %1045 = vmatprep.subr.bf16.mxu0 %v922_v55  ;;  %v620_v4 = vunpack.c.l.bf16 %v607_v62  ;;  %v647_v6 = vpack.c.bf16 %v636_v57, %v635_v56  ;;  %v911_v7 = vmul.f32 %v2205_v14, %v894_v63  ;;  %v621_v10 = vunpack.c.h.bf16 %v607_v62 }
  0x4d   : > { %v912_v8 = vmul.f32 %v2205_v14, %v895_v0  ;;  %v868_v11 = vpack.c.bf16 %v856_v60, %v855_v59  ;;  %v840_v12 = vunpack.c.l.bf16 %v828_v61  ;;  %v841_v13 = vunpack.c.h.bf16 %v828_v61 }
  0x4e   : > { %v883_v16 = vunpack.c.h.f8e4m3fn %v876_v48  ;;  %v579_v17 = vmul.f32 %v2207_v20, %v562_v2  ;;  %v580_v18 = vmul.f32 %v2207_v20, %v563_v3  ;;  %v637_v19 = vmul.f32 %v2202_v9, %v620_v4 }
  0x4f   : > { %v923_v15 = vpack.c.bf16 %v912_v8, %v911_v7  ;;  %v551_v21 = vunpack.c.h.f8e4m3fn %v544_v43  ;;  %v638_v22 = vmul.f32 %v2202_v9, %v621_v10  ;;  %v608_v25 = vunpack.c.l.f8e4m3fn %v2266_v5 }
  0x50   : > { %v896_v23 = vunpack.c.l.bf16 %v883_v16  ;;  %v897_v24 = vunpack.c.h.bf16 %v883_v16  ;;  %v857_v26 = vmul.f32 %v2216_v31, %v840_v12  ;;  %v858_v27 = vmul.f32 %v2216_v31, %v841_v13  ;;  %v982_v13 = vld [vmem:[%s2197_s30 + $0x48] sm:$0xff] }
  0x51   : > { %v829_v28 = vunpack.c.h.f8e4m3fn %v822_v51  ;;  %v591_v34 = vpack.c.bf16 %v580_v18, %v579_v17  ;;  %v564_v35 = vunpack.c.l.bf16 %v551_v21  ;;  %v565_v36 = vunpack.c.h.bf16 %v551_v21 }
  0x52   : > { %775 = vmatpush1.bf16.xpose.msra.mxu1 %v590_v1  ;;  %v913_v30 = vmul.f32 %v2205_v14, %v896_v23  ;;  %v914_v32 = vmul.f32 %v2205_v14, %v897_v24  ;;  %v648_v37 = vpack.c.bf16 %v638_v22, %v637_v19  ;;  %v622_v38 = vunpack.c.l.bf16 %v608_v25 }
  0x53   : > { %776 = vmatprep.subr.bf16.mxu1 %v647_v6  ;;  %1046 = vmatpush1.bf16.xpose.msra.mxu0 %v868_v11  ;;  %v623_v39 = vunpack.c.h.bf16 %v608_v25  ;;  %v884_v40 = vunpack.c.l.f8e4m3fn %v877_v29  ;;  %v869_v42 = vpack.c.bf16 %v858_v27, %v857_v26  ;;  %v842_v43 = vunpack.c.l.bf16 %v829_v28 }
  0x54   : > { %1047 = vmatprep.subr.bf16.mxu0 %v923_v15  ;;  %v843_v44 = vunpack.c.h.bf16 %v829_v28  ;;  %v924_v45 = vpack.c.bf16 %v914_v32, %v913_v30  ;;  %v581_v48 = vmul.f32 %v2207_v20, %v564_v35  ;;  %v582_v49 = vmul.f32 %v2207_v20, %v565_v36  ;;  %v656_v30 = vld [vmem:[%s2192_s29 + $0x40] sm:$0xff] }
  0x55   : > { %v898_v46 = vunpack.c.l.bf16 %v884_v40  ;;  %v899_v47 = vunpack.c.h.bf16 %v884_v40  ;;  %v552_v50 = vunpack.c.l.f8e4m3fn %v2281_v33  ;;  %v639_v51 = vmul.f32 %v2202_v9, %v622_v38  ;;  %v928_v38 = vld [vmem:[%s2197_s30 + $0x40] sm:$0xff] }
  0x56   : > { %v640_v52 = vmul.f32 %v2202_v9, %v623_v39  ;;  %v609_v53 = vunpack.c.h.f8e4m3fn %v2266_v5  ;;  %v859_v54 = vmul.f32 %v2216_v31, %v842_v43  ;;  %v860_v55 = vmul.f32 %v2216_v31, %v843_v44  ;;  %v711_v5 = vld [vmem:[%s2192_s29 + $0x48] sm:$0xff] }
  0x57   : > { %v830_v56 = vunpack.c.l.f8e4m3fn %v2284_v41  ;;  %v915_v57 = vmul.f32 %v2205_v14, %v898_v46  ;;  %v916_v58 = vmul.f32 %v2205_v14, %v899_v47  ;;  %v885_v59 = vunpack.c.h.f8e4m3fn %v877_v29 }
  0x58   : > { %v592_v60 = vpack.c.bf16 %v582_v49, %v581_v48  ;;  %v566_v61 = vunpack.c.l.bf16 %v552_v50  ;;  %v567_v62 = vunpack.c.h.bf16 %v552_v50  ;;  %v649_v63 = vpack.c.bf16 %v640_v52, %v639_v51 }
  0x59   : > { %v624_v0 = vunpack.c.l.bf16 %v609_v53  ;;  %v625_v1 = vunpack.c.h.bf16 %v609_v53  ;;  %v870_v2 = vpack.c.bf16 %v860_v55, %v859_v54  ;;  %v844_v3 = vunpack.c.l.bf16 %v830_v56 }
  0x5a   : > { %777 = vmatpush1.bf16.xpose.msra.mxu1 %v591_v34  ;;  %v845_v4 = vunpack.c.h.bf16 %v830_v56  ;;  %v925_v6 = vpack.c.bf16 %v916_v58, %v915_v57  ;;  %v900_v7 = vunpack.c.l.bf16 %v885_v59  ;;  %v901_v8 = vunpack.c.h.bf16 %v885_v59 }
  0x5b   : > { %778 = vmatprep.subr.bf16.mxu1 %v648_v37  ;;  %1048 = vmatpush1.bf16.xpose.msra.mxu0 %v869_v42  ;;  %v583_v10 = vmul.f32 %v2207_v20, %v566_v61  ;;  %v584_v11 = vmul.f32 %v2207_v20, %v567_v62  ;;  %v553_v12 = vunpack.c.h.f8e4m3fn %v2281_v33  ;;  %v641_v15 = vmul.f32 %v2202_v9, %v624_v0 }
  0x5c   : > { %1049 = vmatprep.subr.bf16.mxu0 %v924_v45  ;;  %v642_v16 = vmul.f32 %v2202_v9, %v625_v1  ;;  %v715_v17 = vunpack.c.l.f8e4m3fn %v711_v5  ;;  %v861_v18 = vmul.f32 %v2216_v31, %v844_v3  ;;  %v862_v19 = vmul.f32 %v2216_v31, %v845_v4  ;;  %v983_v4 = vld [vmem:[%s2197_s30 + $0x58] sm:$0xff] }
  0x5d   : > { %v831_v21 = vunpack.c.h.f8e4m3fn %v2284_v41  ;;  %v917_v22 = vmul.f32 %v2205_v14, %v900_v7  ;;  %v918_v23 = vmul.f32 %v2205_v14, %v901_v8  ;;  %v986_v24 = vunpack.c.l.f8e4m3fn %v982_v13 }
  0x5e   : > { %v593_v25 = vpack.c.bf16 %v584_v11, %v583_v10  ;;  %v568_v9 = vunpack.c.l.bf16 %v553_v12  ;;  %v569_v26 = vunpack.c.h.bf16 %v553_v12  ;;  %v650_v27 = vpack.c.bf16 %v642_v16, %v641_v15 }
  0x5f   : > { %v723_v28 = vunpack.c.l.bf16 %v715_v17  ;;  %v724_v29 = vunpack.c.h.bf16 %v715_v17  ;;  %v871_v32 = vpack.c.bf16 %v862_v19, %v861_v18  ;;  %v846_v33 = vunpack.c.l.bf16 %v831_v21 }
  0x60   : > { %v847_v34 = vunpack.c.h.bf16 %v831_v21  ;;  %v2322_v35 = vstv %s2301_s25  ;;  %v926_v36 = vpack.c.bf16 %v918_v23, %v917_v22  ;;  %v994_v14 = vunpack.c.l.bf16 %v986_v24  ;;  %v657_v23 = vld [vmem:[%s2192_s29 + $0x50] sm:$0xff] }
  0x61   : > { %v995_v37 = vunpack.c.h.bf16 %v986_v24  ;;  %v585_v39 = vmul.f32 %v2207_v20, %v568_v9  ;;  %v586_v40 = vmul.f32 %v2207_v20, %v569_v26  ;;  %v660_v41 = vunpack.c.l.f8e4m3fn %v656_v30 }
  0x62   : > { %779 = vmatpush1.bf16.xpose.msra.mxu1 %v592_v60  ;;  %v2331_v42 = vstv %s2307_s28  ;;  %v740_v43 = vmul.f32 %v2322_v35, %v723_v28  ;;  %v741_v44 = vmul.f32 %v2322_v35, %v724_v29  ;;  %v716_v45 = vunpack.c.h.f8e4m3fn %v711_v5  ;;  %v712_v60 = vld [vmem:[%s2192_s29 + $0x58] sm:$0xff]  ;;  %v929_v29 = vld [vmem:[%s2197_s30 + $0x50] sm:$0xff] }
  0x63   : > { %780 = vmatprep.subr.bf16.mxu1 %v649_v63  ;;  %1050 = vmatpush1.bf16.xpose.msra.mxu0 %v870_v2  ;;  %v863_v46 = vmul.f32 %v2216_v31, %v846_v33  ;;  %v864_v47 = vmul.f32 %v2216_v31, %v847_v34  ;;  %v932_v48 = vunpack.c.l.f8e4m3fn %v928_v38  ;;  %v1011_v20 = vmul.f32 %v2331_v42, %v994_v14 }
  0x64   : > { %1051 = vmatprep.subr.bf16.mxu0 %v925_v6  ;;  %v1012_v49 = vmul.f32 %v2331_v42, %v995_v37  ;;  %v987_v50 = vunpack.c.h.f8e4m3fn %v982_v13  ;;  %v594_v51 = vpack.c.bf16 %v586_v40, %v585_v39  ;;  %v668_v52 = vunpack.c.l.bf16 %v660_v41 }
  0x65   : > { %v669_v53 = vunpack.c.h.bf16 %v660_v41  ;;  %v756_v54 = vpack.c.bf16 %v741_v44, %v740_v43  ;;  %v2340_v55 = vstv %s2318_s9  ;;  %v725_v56 = vunpack.c.l.bf16 %v716_v45 }
  0x66   : > { %v726_v57 = vunpack.c.h.bf16 %v716_v45  ;;  %v872_v58 = vpack.c.bf16 %v864_v47, %v863_v46  ;;  %v940_v31 = vunpack.c.l.bf16 %v932_v48  ;;  %v941_v59 = vunpack.c.h.bf16 %v932_v48 }
  0x67   : > { %v1027_v61 = vpack.c.bf16 %v1012_v49, %v1011_v20  ;;  %v2344_v62 = vstv %s2325_s10  ;;  %v996_v63 = vunpack.c.l.bf16 %v987_v50  ;;  %v997_v0 = vunpack.c.h.bf16 %v987_v50 }
  0x68   : > { %v685_v1 = vmul.f32 %v2340_v55, %v668_v52  ;;  %v686_v2 = vmul.f32 %v2340_v55, %v669_v53  ;;  %v661_v3 = vunpack.c.h.f8e4m3fn %v656_v30  ;;  %v742_v5 = vmul.f32 %v2322_v35, %v725_v56  ;;  %v713_v52 = vld [vmem:[%s2192_s29 + $0x68] sm:$0xff] }
  0x69   : > { %v743_v6 = vmul.f32 %v2322_v35, %v726_v57  ;;  %v717_v7 = vunpack.c.l.f8e4m3fn %v712_v60  ;;  %v957_v8 = vmul.f32 %v2344_v62, %v940_v31  ;;  %v958_v10 = vmul.f32 %v2344_v62, %v941_v59  ;;  %v984_v59 = vld [vmem:[%s2197_s30 + $0x68] sm:$0xff] }
  0x6a   : > { %781 = vmatpush1.bf16.xpose.msra.mxu1 %v593_v25  ;;  %v933_v11 = vunpack.c.h.f8e4m3fn %v928_v38  ;;  %v1013_v12 = vmul.f32 %v2331_v42, %v996_v63  ;;  %v1014_v13 = vmul.f32 %v2331_v42, %v997_v0  ;;  %v988_v15 = vunpack.c.l.f8e4m3fn %v983_v4 }
  0x6b   : > { %782 = vmatprep.subr.bf16.mxu1 %v650_v27  ;;  %1052 = vmatpush1.bf16.xpose.msra.mxu0 %v871_v32  ;;  %v701_v16 = vpack.c.bf16 %v686_v2, %v685_v1  ;;  %v670_v17 = vunpack.c.l.bf16 %v661_v3  ;;  %v671_v18 = vunpack.c.h.bf16 %v661_v3  ;;  %v757_v19 = vpack.c.bf16 %v743_v6, %v742_v5  ;;  %v2376_v5 = vld [vmem:[%s2192_s29 + $0x60] sm:$0xff] }
  0x6c   : > { %1053 = vmatprep.subr.bf16.mxu0 %v926_v36  ;;  %v727_v21 = vunpack.c.l.bf16 %v717_v7  ;;  %v728_v22 = vunpack.c.h.bf16 %v717_v7  ;;  %v973_v24 = vpack.c.bf16 %v958_v10, %v957_v8  ;;  %v942_v25 = vunpack.c.l.bf16 %v933_v11 }
  0x6d   : > { %v943_v9 = vunpack.c.h.bf16 %v933_v11  ;;  %v1028_v26 = vpack.c.bf16 %v1014_v13, %v1013_v12  ;;  %v998_v27 = vunpack.c.l.bf16 %v988_v15  ;;  %v999_v28 = vunpack.c.h.bf16 %v988_v15 }
  0x6e   : > { %v687_v30 = vmul.f32 %v2340_v55, %v670_v17  ;;  %v688_v32 = vmul.f32 %v2340_v55, %v671_v18  ;;  %v662_v33 = vunpack.c.l.f8e4m3fn %v657_v23  ;;  %v744_v34 = vmul.f32 %v2322_v35, %v727_v21 }
  0x6f   : > { %v745_v36 = vmul.f32 %v2322_v35, %v728_v22  ;;  %v718_v14 = vunpack.c.h.f8e4m3fn %v712_v60  ;;  %v959_v37 = vmul.f32 %v2344_v62, %v942_v25  ;;  %v960_v38 = vmul.f32 %v2344_v62, %v943_v9 }
  0x70   : > { %v934_v39 = vunpack.c.l.f8e4m3fn %v929_v29  ;;  %v1015_v40 = vmul.f32 %v2331_v42, %v998_v27  ;;  %v1016_v41 = vmul.f32 %v2331_v42, %v999_v28  ;;  %v989_v43 = vunpack.c.h.f8e4m3fn %v983_v4 }
  0x71   : > { %v702_v44 = vpack.c.bf16 %v688_v32, %v687_v30  ;;  %v672_v45 = vunpack.c.l.bf16 %v662_v33  ;;  %v673_v46 = vunpack.c.h.bf16 %v662_v33  ;;  %v758_v47 = vpack.c.bf16 %v745_v36, %v744_v34 }
  0x72   : > { %783 = vmatpush1.bf16.xpose.msra.mxu1 %v594_v51  ;;  %v729_v48 = vunpack.c.l.bf16 %v718_v14  ;;  %v730_v20 = vunpack.c.h.bf16 %v718_v14  ;;  %v974_v49 = vpack.c.bf16 %v960_v38, %v959_v37  ;;  %v944_v50 = vunpack.c.l.bf16 %v934_v39 }
  0x73   : > { %784 = vmatprep.subr.bf16.mxu1 %v756_v54  ;;  %1054 = vmatpush1.bf16.xpose.msra.mxu0 %v872_v58  ;;  %v945_v51 = vunpack.c.h.bf16 %v934_v39  ;;  %v1029_v53 = vpack.c.bf16 %v1016_v41, %v1015_v40  ;;  %v1000_v54 = vunpack.c.l.bf16 %v989_v43  ;;  %v1001_v56 = vunpack.c.h.bf16 %v989_v43 }
  0x74   : > { %1055 = vmatprep.subr.bf16.mxu0 %v1027_v61  ;;  %v689_v57 = vmul.f32 %v2340_v55, %v672_v45  ;;  %v690_v58 = vmul.f32 %v2340_v55, %v673_v46  ;;  %v663_v31 = vunpack.c.h.f8e4m3fn %v657_v23  ;;  %v746_v60 = vmul.f32 %v2322_v35, %v729_v48  ;;  %v930_v23 = vld [vmem:[%s2197_s30 + $0x60] sm:$0xff]  ;;  %v714_v46 = vld [vmem:[%s2192_s29 + $0x78] sm:$0xff] }
  0x75   : > { %v747_v61 = vmul.f32 %v2322_v35, %v730_v20  ;;  %v719_v63 = vunpack.c.l.f8e4m3fn %v713_v52  ;;  %v961_v0 = vmul.f32 %v2344_v62, %v944_v50  ;;  %v962_v1 = vmul.f32 %v2344_v62, %v945_v51  ;;  %v985_v51 = vld [vmem:[%s2197_s30 + $0x78] sm:$0xff] }
  0x76   : > { %v935_v2 = vunpack.c.h.f8e4m3fn %v929_v29  ;;  %v1017_v3 = vmul.f32 %v2331_v42, %v1000_v54  ;;  %v1018_v4 = vmul.f32 %v2331_v42, %v1001_v56  ;;  %v990_v6 = vunpack.c.l.f8e4m3fn %v984_v59 }
  0x77   : > { %v703_v7 = vpack.c.bf16 %v690_v58, %v689_v57  ;;  %v674_v8 = vunpack.c.l.bf16 %v663_v31  ;;  %v675_v10 = vunpack.c.h.bf16 %v663_v31  ;;  %v759_v11 = vpack.c.bf16 %v747_v61, %v746_v60 }
  0x78   : > { %v731_v12 = vunpack.c.l.bf16 %v719_v63  ;;  %v732_v13 = vunpack.c.h.bf16 %v719_v63  ;;  %v975_v15 = vpack.c.bf16 %v962_v1, %v961_v0  ;;  %v947_v17 = vunpack.c.h.bf16 %v935_v2 }
  0x79   : > { %v664_v18 = vunpack.c.l.f8e4m3fn %v2376_v5  ;;  %v1002_v21 = vunpack.c.l.bf16 %v990_v6  ;;  %v1003_v22 = vunpack.c.h.bf16 %v990_v6  ;;  %v692_v25 = vmul.f32 %v2340_v55, %v675_v10 }
  0x7a   : > { %785 = vmatpush1.bf16.xpose.msra.mxu1 %v701_v16  ;;  %v946_v16 = vunpack.c.l.bf16 %v935_v2  ;;  %v748_v9 = vmul.f32 %v2322_v35, %v731_v12  ;;  %v720_v27 = vunpack.c.h.f8e4m3fn %v713_v52  ;;  %v964_v29 = vmul.f32 %v2344_v62, %v947_v17 }
  0x7b   : > { %786 = vmatprep.subr.bf16.mxu1 %v757_v19  ;;  %1056 = vmatpush1.bf16.xpose.msra.mxu0 %v973_v24  ;;  %v1030_v19 = vpack.c.bf16 %v1018_v4, %v1017_v3  ;;  %v691_v24 = vmul.f32 %v2340_v55, %v674_v8  ;;  %v676_v30 = vunpack.c.l.bf16 %v664_v18  ;;  %v936_v32 = vunpack.c.l.f8e4m3fn %v930_v23  ;;  %v659_v4 = vld [vmem:[%s2192_s29 + $0x70] sm:$0xff] }
  0x7c   : > { %1057 = vmatprep.subr.bf16.mxu0 %v1028_v26  ;;  %v749_v26 = vmul.f32 %v2322_v35, %v732_v13  ;;  %v963_v28 = vmul.f32 %v2344_v62, %v946_v16  ;;  %v677_v33 = vunpack.c.h.bf16 %v664_v18  ;;  %v1019_v34 = vmul.f32 %v2331_v42, %v1002_v21  ;;  %v931_v13 = vld [vmem:[%s2197_s30 + $0x70] sm:$0xff] }
  0x7d   : > { %v1020_v36 = vmul.f32 %v2331_v42, %v1003_v22  ;;  %v991_v14 = vunpack.c.h.f8e4m3fn %v984_v59  ;;  %v704_v37 = vpack.c.bf16 %v692_v25, %v691_v24  ;;  %v733_v39 = vunpack.c.l.bf16 %v720_v27 }
  0x7e   : > { %v760_v38 = vpack.c.bf16 %v749_v26, %v748_v9  ;;  %v734_v40 = vunpack.c.h.bf16 %v720_v27  ;;  %v976_v41 = vpack.c.bf16 %v964_v29, %v963_v28  ;;  %v693_v43 = vmul.f32 %v2340_v55, %v676_v30 }
  0x7f   : > { %v949_v45 = vunpack.c.h.bf16 %v936_v32  ;;  %v1031_v48 = vpack.c.bf16 %v1020_v36, %v1019_v34  ;;  %v1004_v20 = vunpack.c.l.bf16 %v991_v14  ;;  %v665_v50 = vunpack.c.h.f8e4m3fn %v2376_v5 }
  0x80   : > { %v750_v52 = vmul.f32 %v2322_v35, %v733_v39  ;;  %v721_v54 = vunpack.c.l.f8e4m3fn %v714_v46  ;;  %v937_v58 = vunpack.c.h.f8e4m3fn %v930_v23  ;;  %v992_v61 = vunpack.c.l.f8e4m3fn %v985_v51 }
  0x81   : > { %v966_v57 = vmul.f32 %v2344_v62, %v949_v45  ;;  %v1021_v59 = vmul.f32 %v2331_v42, %v1004_v20  ;;  %v678_v63 = vunpack.c.l.bf16 %v665_v50  ;;  %v679_v0 = vunpack.c.h.bf16 %v665_v50 }
  0x82   : > { %787 = vmatpush1.bf16.xpose.msra.mxu1 %v702_v44  ;;  %v948_v44 = vunpack.c.l.bf16 %v936_v32  ;;  %v735_v2 = vunpack.c.l.bf16 %v721_v54  ;;  %v736_v3 = vunpack.c.h.bf16 %v721_v54  ;;  %v2069_v5 = vmov 0.0  }
  0x83   : > { %788 = vmatprep.subr.bf16.mxu1 %v758_v47  ;;  %1058 = vmatpush1.bf16.xpose.msra.mxu0 %v974_v49  ;;  %v694_v47 = vmul.f32 %v2340_v55, %v677_v33  ;;  %v1005_v49 = vunpack.c.h.bf16 %v991_v14  ;;  %464 = vst.msk [vmem:[#allocation4] sm:$0xff] %vm463_vm0, %v2069_v5  ;;  %465 = vst.msk [vmem:[#allocation4 + $0x8] sm:$0xff] %vm463_vm0, %v2069_v5  ;;  %v951_v8 = vunpack.c.h.bf16 %v937_v58  ;;  %v1007_v12 = vunpack.c.h.bf16 %v992_v61  ;;  %v1957_v5 = vld [vmem:[%s2243_s22 + $0x48] sm:$0xff]  }
  0x84   : > { %1059 = vmatprep.subr.bf16.mxu0 %v1029_v53  ;;  %v751_v53 = vmul.f32 %v2322_v35, %v734_v40  ;;  %v965_v56 = vmul.f32 %v2344_v62, %v948_v44  ;;  %v696_v16 = vmul.f32 %v2340_v55, %v679_v0  ;;  %v666_v17 = vunpack.c.l.f8e4m3fn %v659_v4  ;;  %v1953_v0 = vld [vmem:[%s2243_s22 + $0x40] sm:$0xff]  }
  0x85   : > { %v705_v31 = vpack.c.bf16 %v694_v47, %v693_v43  ;;  %v1022_v60 = vmul.f32 %v2331_v42, %v1005_v49  ;;  %v752_v18 = vmul.f32 %v2322_v35, %v735_v2  ;;  %v722_v21 = vunpack.c.h.f8e4m3fn %v714_v46 }
  0x86   : > { %v761_v1 = vpack.c.bf16 %v751_v53, %v750_v52  ;;  %v977_v6 = vpack.c.bf16 %v966_v57, %v965_v56  ;;  %v968_v23 = vmul.f32 %v2344_v62, %v951_v8  ;;  %v938_v24 = vunpack.c.l.f8e4m3fn %v931_v13 }
  0x87   : > { %v1032_v10 = vpack.c.bf16 %v1022_v60, %v1021_v59  ;;  %v1024_v9 = vmul.f32 %v2331_v42, %v1007_v12  ;;  %v993_v26 = vunpack.c.h.f8e4m3fn %v985_v51  ;;  %v680_v28 = vunpack.c.l.bf16 %v666_v17  ;;  %v1961_v12 = vld [vmem:[%s2243_s22 + $0x50] sm:$0xff]  }
  0x88   : > { %v681_v29 = vunpack.c.h.bf16 %v666_v17  ;;  %v737_v32 = vunpack.c.l.bf16 %v722_v21  ;;  %v738_v33 = vunpack.c.h.bf16 %v722_v21  ;;  %v952_v36 = vunpack.c.l.bf16 %v938_v24  ;;  %v1964_v17 = vld [vmem:[%s2238_s0 + $0x58] sm:$0xff]  }
  0x89   : > { %v953_v14 = vunpack.c.h.bf16 %v938_v24  ;;  %v1009_v39 = vunpack.c.h.bf16 %v993_v26  ;;  %v697_v40 = vmul.f32 %v2340_v55, %v680_v28  ;;  %v667_v43 = vunpack.c.h.f8e4m3fn %v659_v4  ;;  %v1966_v21 = vld [vmem:[%s2238_s0 + $0x18] sm:$0xff]   ;;  %v1968_v24 = vld [vmem:[%s2238_s0 + $0x60] sm:$0xff]  }
  0x8a   : > { %789 = vmatpush1.bf16.xpose.msra.mxu1 %v703_v7  ;;  %v950_v7 = vunpack.c.l.bf16 %v937_v58  ;;  %v754_v44 = vmul.f32 %v2322_v35, %v737_v32  ;;  %v755_v45 = vmul.f32 %v2322_v35, %v738_v33  ;;  %v969_v46 = vmul.f32 %v2344_v62, %v952_v36  ;;  %v1973_v32 = vld [vmem:[%s2243_s22 + $0x68] sm:$0xff]  }
  0x8b   : > { %790 = vmatprep.subr.bf16.mxu1 %v759_v11  ;;  %1060 = vmatpush1.bf16.xpose.msra.mxu0 %v975_v15  ;;  %v1006_v11 = vunpack.c.l.bf16 %v992_v61  ;;  %v695_v15 = vmul.f32 %v2340_v55, %v678_v63  ;;  %v970_v47 = vmul.f32 %v2344_v62, %v953_v14  ;;  %v1026_v49 = vmul.f32 %v2331_v42, %v1009_v39  ;;  %v1952_v61 = vld [vmem:[%s2238_s0 + $0x40] sm:$0xff]   ;;  %v1974_v33 = vld [vmem:[%s2238_s0 + $0x28] sm:$0xff]   ;;  %v1976_v14 = vld [vmem:[%s2238_s0 + $0x70] sm:$0xff]  }
  0x8c   : > { %1061 = vmatprep.subr.bf16.mxu0 %v1030_v19  ;;  %v753_v19 = vmul.f32 %v2322_v35, %v736_v3  ;;  %v967_v22 = vmul.f32 %v2344_v62, %v950_v7  ;;  %v682_v51 = vunpack.c.l.bf16 %v667_v43  ;;  %v683_v52 = vunpack.c.h.bf16 %v667_v43  ;;  %v2000_v3 = vld [vmem:[%s2519_s2] ss:$8 sps:$4 sm:$0xff]   ;;  %v1978_v39 = vld [vmem:[%s2238_s0 + $0x30] sm:$0xff]   ;;  %v1980_v43 = vld [vmem:[%s2238_s0 + $0x78] sm:$0xff]  }
  0x8d   : > { %v1023_v25 = vmul.f32 %v2331_v42, %v1006_v11  ;;  %v706_v27 = vpack.c.bf16 %v696_v16, %v695_v15  ;;  %v763_v53 = vpack.c.bf16 %v755_v45, %v754_v44  ;;  %v979_v54 = vpack.c.bf16 %v970_v47, %v969_v46  ;;  %v1959_v7 = vld [vmem:[%s2243_s22 + $0x8] sm:$0xff]   ;;  %v1963_v15 = vld [vmem:[%s2243_s22 + $0x10] sm:$0xff]   ;;  %v1981_v45 = vld [vmem:[%s2243_s22 + $0x78] sm:$0xff]  }
  0x8e   : > { %v762_v30 = vpack.c.bf16 %v753_v19, %v752_v18  ;;  %v978_v34 = vpack.c.bf16 %v968_v23, %v967_v22  ;;  %v699_v58 = vmul.f32 %v2340_v55, %v682_v51  ;;  %v1434_v11 = vsel %vm463_vm0, %v1959_v7, 0  ;;  %v1965_v19 = vld [vmem:[%s2243_s22 + $0x58] sm:$0xff]   ;;  %v469_v51 = vld [vmem:[#allocation4 + $0x8] sm:$0xff] }
  0x8f   : > { %v1437_v18 = vsel %vm463_vm0, %v1963_v15, 0  ;;  %v1967_v22 = vld [vmem:[%s2243_s22 + $0x18] sm:$0xff]   ;;  %v1229_v23 = vsel %vm463_vm0, %v1966_v21, 0  ;;  %v1235_v36 = vsel %vm463_vm0, %v1974_v33, 0 }
  0x90   : > { %v1982_v46 = vld [vmem:[%s2238_s0 + $0x38] sm:$0xff]  }
  0x91   : > { %v1983_v47 = vld [vmem:[%s2243_s22 + $0x38] sm:$0xff]  }
  0x92   : > { %791 = vmatpush1.bf16.xpose.msra.mxu1 %v704_v37  ;;  %v1033_v37 = vpack.c.bf16 %v1024_v9, %v1023_v25  ;;  %v1440_v25 = vsel %vm463_vm0, %v1967_v22, 0  ;;  %v1969_v9 = vld [vmem:[%s2243_s22 + $0x60] sm:$0xff]  }
  0x93   : > { %792 = vmatprep.subr.bf16.mxu1 %v760_v38  ;;  %1062 = vmatpush1.bf16.xpose.msra.mxu0 %v976_v41  ;;  %v1008_v38 = vunpack.c.l.bf16 %v993_v26  ;;  %v698_v41 = vmul.f32 %v2340_v55, %v681_v29  ;;  %v1970_v26 = vld [vmem:[%s2238_s0 + $0x20] sm:$0xff]   ;;  %v1972_v29 = vld [vmem:[%s2238_s0 + $0x68] sm:$0xff]  }
  0x94   : > { %1063 = vmatprep.subr.bf16.mxu0 %v1031_v48  ;;  %v939_v48 = vunpack.c.h.f8e4m3fn %v931_v13  ;;  %v1962_v13 = vld [vmem:[%s2238_s0 + $0x10] sm:$0xff]   ;;  %v1232_v28 = vsel %vm463_vm0, %v1970_v26, 0 }
  0x95   : > { %v1025_v20 = vmul.f32 %v2331_v42, %v1008_v38  ;;  %v707_v50 = vpack.c.bf16 %v698_v41, %v697_v40  ;;  %v1226_v16 = vsel %vm463_vm0, %v1962_v13, 0  ;;  %v1977_v38 = vld [vmem:[%s2243_s22 + $0x70] sm:$0xff]   ;;  %v1238_v41 = vsel %vm463_vm0, %v1978_v39, 0 }
  0x96   : > { %v954_v56 = vunpack.c.l.bf16 %v939_v48  ;;  %v955_v35 = vunpack.c.h.bf16 %v939_v48  ;;  %v1979_v40 = vld [vmem:[%s2243_s22 + $0x30] sm:$0xff]   ;;  %v1241_v48 = vsel %vm463_vm0, %v1982_v46, 0 }
  0x97   : > { %v1034_v57 = vpack.c.bf16 %v1026_v49, %v1025_v20  ;;  %v1449_v44 = vsel %vm463_vm0, %v1979_v40, 0  ;;  %v1452_v20 = vsel %vm463_vm0, %v1983_v47, 0  ;;  %v468_v49 = vld [vmem:[#allocation4] sm:$0xff] }
  0x98   : > { %v971_v42 = vmul.f32 %v2344_v62, %v954_v56  ;;  %v972_v59 = vmul.f32 %v2344_v62, %v955_v35  ;;  %v1956_v62 = vld [vmem:[%s2238_s0 + $0x48] sm:$0xff]  }
  0x9a   : > { %793 = vmatpush1.bf16.xpose.msra.mxu1 %v705_v31  ;;  %v700_v31 = vmul.f32 %v2340_v55, %v683_v52  ;;  %v980_v63 = vpack.c.bf16 %v972_v59, %v971_v42  ;;  %v1955_v55 = vld [vmem:[%s2243_s22] sm:$0xff]  }
  0x9b   : > { %794 = vmatprep.subr.bf16.mxu1 %v761_v1  ;;  %1064 = vmatpush1.bf16.xpose.msra.mxu0 %v977_v6  ;;  %v1954_v1 = vld [vmem:[%s2238_s0] sm:$0xff]   ;;  %v1431_v4 = vsel %vm463_vm0, %v1955_v55, 0  ;;  %v1958_v6 = vld [vmem:[%s2238_s0 + $0x8] sm:$0xff]  }
  0x9c   : > { %1065 = vmatprep.subr.bf16.mxu0 %v1032_v10  ;;  %v708_v60 = vpack.c.bf16 %v700_v31, %v699_v58  ;;  %v1220_v2 = vsel %vm463_vm0, %v1954_v1, 0  ;;  %v1223_v8 = vsel %vm463_vm0, %v1958_v6, 0  ;;  %v1960_v10 = vld [vmem:[%s2238_s0 + $0x50] sm:$0xff]   ;;  %s1587_s0 = scalar_lea.vmem (%p2153_p13), %s2525_s8, %s2168_s26 }
  0xa2   : > { %795 = vmatpush1.bf16.xpose.msra.mxu1 %v706_v27  ;;  %v1971_v27 = vld [vmem:[%s2243_s22 + $0x20] sm:$0xff]  }
  0xa3   : > { %796 = vmatprep.subr.bf16.mxu1 %v762_v30  ;;  %1066 = vmatpush1.bf16.xpose.msra.mxu0 %v978_v34  ;;  %v1443_v30 = vsel %vm463_vm0, %v1971_v27, 0  ;;  %v1975_v34 = vld [vmem:[%s2243_s22 + $0x28] sm:$0xff]  }
  0xa4   : > { %1067 = vmatprep.subr.bf16.mxu0 %v1033_v37  ;;  %v1446_v37 = vsel %vm463_vm0, %v1975_v34, 0 }
  0xaa   : > { %797 = vmatpush1.bf16.xpose.msra.mxu1 %v707_v50 }
  0xab   : > { %798 = vmatprep.subr.bf16.mxu1 %v763_v53  ;;  %1068 = vmatpush1.bf16.xpose.msra.mxu0 %v979_v54 }
  0xac   : > { %1069 = vmatprep.subr.bf16.mxu0 %v1034_v57 }
  0xb2   : > { %799 = vmatpush1.bf16.xpose.msra.mxu1 %v708_v60 }
  0xb3   : > { %1887 = vmatprep.subr.msk.bf16.mxu1 %vm463_vm0, %v1952_v61  ;;  %1070 = vmatpush1.bf16.xpose.msra.mxu0 %v980_v63 }
  0xb4   : > { %1895 = vmatprep.subr.msk.bf16.mxu0 %vm463_vm0, %v1953_v0 }
  0xb9   : > { %801 = vmatmul.mubr.bf16.vlgmr.msra.gmra.mrb[0].mxu1 %v2000_v3 }
  0xba   : > { %1852 = vmatpush3.bf16.xpose.msra.mxu1 %v1220_v2  ;;  %1072 = vmatmul.mubr.bf16.vlgmr.msra.gmra.mrb[4].mxu0 %v2000_v3 }
  0xbb   : > { %1888 = vmatprep.subr.msk.bf16.mxu1 %vm463_vm0, %v1956_v62  ;;  %1870 = vmatpush3.bf16.xpose.msra.mxu0 %v1431_v4 }
  0xbc   : > { %1896 = vmatprep.subr.msk.bf16.mxu0 %vm463_vm0, %v1957_v5 }
  0xc2   : > { %1854 = vmatpush3.bf16.xpose.msra.mxu1 %v1223_v8 }
  0xc3   : > { %1889 = vmatprep.subr.msk.bf16.mxu1 %vm463_vm0, %v1960_v10  ;;  %1872 = vmatpush3.bf16.xpose.msra.mxu0 %v1434_v11 }
  0xc4   : > { %1897 = vmatprep.subr.msk.bf16.mxu0 %vm463_vm0, %v1961_v12 }
  0xca   : > { %1856 = vmatpush3.bf16.xpose.msra.mxu1 %v1226_v16 }
  0xcb   : > { %1890 = vmatprep.subr.msk.bf16.mxu1 %vm463_vm0, %v1964_v17  ;;  %1874 = vmatpush3.bf16.xpose.msra.mxu0 %v1437_v18 }
  0xcc   : > { %1898 = vmatprep.subr.msk.bf16.mxu0 %vm463_vm0, %v1965_v19 }
  0xd2   : > { %1858 = vmatpush3.bf16.xpose.msra.mxu1 %v1229_v23 }
  0xd3   : > { %1891 = vmatprep.subr.msk.bf16.mxu1 %vm463_vm0, %v1968_v24  ;;  %1876 = vmatpush3.bf16.xpose.msra.mxu0 %v1440_v25 }
  0xd4   : > { %1899 = vmatprep.subr.msk.bf16.mxu0 %vm463_vm0, %v1969_v9 }
  0xda   : > { %1860 = vmatpush3.bf16.xpose.msra.mxu1 %v1232_v28 }
  0xdb   : > { %1892 = vmatprep.subr.msk.bf16.mxu1 %vm463_vm0, %v1972_v29  ;;  %1878 = vmatpush3.bf16.xpose.msra.mxu0 %v1443_v30 }
  0xdc   : > { %1900 = vmatprep.subr.msk.bf16.mxu0 %vm463_vm0, %v1973_v32 }
  0xe2   : > { %1862 = vmatpush3.bf16.xpose.msra.mxu1 %v1235_v36 }
  0xe3   : > { %1893 = vmatprep.subr.msk.bf16.mxu1 %vm463_vm0, %v1976_v14  ;;  %1880 = vmatpush3.bf16.xpose.msra.mxu0 %v1446_v37 }
  0xe4   : > { %1901 = vmatprep.subr.msk.bf16.mxu0 %vm463_vm0, %v1977_v38 }
  0xea   : > { %1864 = vmatpush3.bf16.xpose.msra.mxu1 %v1238_v41 }
  0xeb   : > { %1894 = vmatprep.subr.msk.bf16.mxu1 %vm463_vm0, %v1980_v43  ;;  %1882 = vmatpush3.bf16.xpose.msra.mxu0 %v1449_v44 }
  0xec   : > { %1902 = vmatprep.subr.msk.bf16.mxu0 %vm463_vm0, %v1981_v45 }
  0xf2   : > { %1866 = vmatpush3.bf16.xpose.msra.mxu1 %v1241_v48 }
  0xf3   : > { %1884 = vmatpush3.bf16.xpose.msra.mxu0 %v1452_v20 }
 0x101   : > { %v526_v50 = vpop.f32.mrb[0].mxu0 }
 0x102   : > { %v533_v52 = vadd.f32 %v526_v50, %v468_v49  ;;  %v528_v53 = vpop.f32.mrb[1].mxu0 }
 0x103   : > { %v529_v54 = vpop.f32.mrb[2].mxu0 }
 0x104   : > { %536 = vst.msk [vmem:[#allocation4] sm:$0xff] %vm463_vm0, %v533_v52  ;;  %v534_v56 = vadd.f32 %v529_v54, %v469_v51  ;;  %v531_v35 = vpop.f32.mrb[3].mxu0 }
 0x106   : > { %537 = vst.msk [vmem:[#allocation4 + $0x8] sm:$0xff] %vm463_vm0, %v534_v56 }
 0x10b   : > { %v1101_v57 = vld [vmem:[#allocation4] sm:$0xff] }
 0x10d   : > { %v1102_v58 = vld [vmem:[#allocation4 + $0x8] sm:$0xff] }
 0x10e   : > { %v1103_v31 = vpack.c.bf16 %v1102_v58, %v1101_v57 }
 0x110   : > { %1867 = vmatprep.mubr.msk.bf16.mxu1 %vm463_vm0, %v1103_v31  ;;  %1885 = vmatprep.mubr.msk.bf16.mxu0 %vm463_vm0, %v1103_v31 }
 0x111   : > { %1868 = vmatmul.mubr.msk.bf16.vlgmr.msra.gmra.mrb[4].mxu1 %vm463_vm0, %v1103_v31  ;;  %1886 = vmatmul.mubr.msk.bf16.vlgmr.msra.gmra.mrb[8].mxu0 %vm463_vm0, %v1103_v31 }
 0x18c   : > { %v802_v42 = vpop.f32.mrb[0].mxu1 }
 0x18d   : > { %v804_v59 = vpop.f32.mrb[1].mxu1  ;;  %v1073_v61 = vpop.f32.mrb[4].mxu0 }
 0x18e   : > { %v806_v60 = vpop.f32.mrb[2].mxu1  ;;  %v1075_v0 = vpop.f32.mrb[5].mxu0 }
 0x18f   : > { %v808_v63 = vpop.f32.mrb[3].mxu1  ;;  %v1077_v1 = vpop.f32.mrb[6].mxu0 }
 0x190   : > { %v1079_v55 = vpop.f32.mrb[7].mxu0 }
 0x1e4   : > { %v1301_v2 = vpop.f32.mrb[4].mxu1  ;;  %v1512_v62 = vpop.f32.mrb[8].mxu0 }
 0x1e5   : > { %v1310_v3 = vmul.f32 2.0, %v1301_v2  ;;  %v1521_v4 = vmul.f32 2.0, %v1512_v62  ;;  %v1303_v5 = vpop.f32.mrb[5].mxu1  ;;  %v1514_v6 = vpop.f32.mrb[9].mxu0 }
 0x1e6   : > { %v1311_v7 = vmul.f32 2.0, %v1303_v5  ;;  %v1522_v8 = vmul.f32 2.0, %v1514_v6  ;;  %v1305_v10 = vpop.f32.mrb[6].mxu1  ;;  %v1516_v11 = vpop.f32.mrb[10].mxu0 }
 0x1e7   : > { %v1314_v12 = vadd.f32 %v1310_v3, %v802_v42  ;;  %v1525_v13 = vadd.f32 %v1521_v4, %v1073_v61  ;;  %v1312_v15 = vmul.f32 2.0, %v1305_v10  ;;  %v1523_v16 = vmul.f32 2.0, %v1516_v11  ;;  %v1307_v17 = vpop.f32.mrb[7].mxu1  ;;  %v1518_v18 = vpop.f32.mrb[11].mxu0 }
 0x1e8   : > { %v1315_v19 = vadd.f32 %v1311_v7, %v804_v59  ;;  %v1526_v21 = vadd.f32 %v1522_v8, %v1075_v0  ;;  %v1313_v22 = vmul.f32 2.0, %v1307_v17  ;;  %v1524_v23 = vmul.f32 2.0, %v1518_v18 }
 0x1e9   : > { %v1832_v24 = vmul.f32 -1.442695, %v1314_v12  ;;  %v1316_v25 = vadd.f32 %v1312_v15, %v806_v60  ;;  %v1527_v9 = vadd.f32 %v1523_v16, %v1077_v1 }
 0x1ea   : > { %v1833_v26 = vmul.f32 -1.442695, %v1315_v19  ;;  %v1317_v27 = vadd.f32 %v1313_v22, %v808_v63  ;;  %v1528_v28 = vadd.f32 %v1524_v23, %v1079_v55 }
 0x1eb   : > { %1984 = vpow2.f32 %v1832_v24  ;;  %v1834_v29 = vmul.f32 -1.442695, %v1316_v25 }
 0x1ec   : > { %1986 = vpow2.f32 %v1833_v26  ;;  %v1835_v30 = vmul.f32 -1.442695, %v1317_v27 }
 0x1ed   : > { %1988 = vpow2.f32 %v1834_v29 }
 0x1ee   : > { %1990 = vpow2.f32 %v1835_v30 }
 0x1f5   : > { %v1985_v32 = vpop.eup %1984 }
 0x1f6   : > { %v1987_v33 = vpop.eup %1986  ;;  %v1541_v34 = vadd.f32 1.0, %v1985_v32 }
 0x1f7   : > { %v1989_v36 = vpop.eup %1988  ;;  %v1542_v14 = vadd.f32 1.0, %v1987_v33 }
 0x1f8   : > { %v1991_v37 = vpop.eup %1990  ;;  %1992 = vrcp.f32 %v1541_v34  ;;  %v1543_v38 = vadd.f32 1.0, %v1989_v36 }
 0x1f9   : > { %1994 = vrcp.f32 %v1542_v14  ;;  %v1544_v39 = vadd.f32 1.0, %v1991_v37 }
 0x1fa   : > { %1996 = vrcp.f32 %v1543_v38 }
 0x1fb   : > { %1998 = vrcp.f32 %v1544_v39 }
 0x202   : > { %v1993_v40 = vpop.eup %1992 }
 0x203   : > { %v1995_v41 = vpop.eup %1994  ;;  %v1553_v43 = vmul.f32 %v1993_v40, %v1314_v12 }
 0x204   : > { %v1997_v44 = vpop.eup %1996  ;;  %v1554_v45 = vmul.f32 %v1995_v41, %v1315_v19 }
 0x205   : > { %v1999_v46 = vpop.eup %1998  ;;  %v1557_v47 = vmul.f32 %v1553_v43, %v1525_v13  ;;  %v1555_v48 = vmul.f32 %v1997_v44, %v1316_v25 }
 0x206   : > { %v1558_v20 = vmul.f32 %v1554_v45, %v1526_v21  ;;  %v1556_v49 = vmul.f32 %v1999_v46, %v1317_v27  ;;  %1581 = sbr.rel (!%p2153_p13) target bundleno = 533 (0x215), region = 56 }
 0x207   : > { %v1559_v50 = vmul.f32 %v1555_v48, %v1527_v9 }
 0x208   : > { %v1847_v51 = vpack.c.bf16 %v1558_v20, %v1557_v47  ;;  %v1560_v52 = vmul.f32 %v1556_v49, %v1528_v28 }
 0x20a   : > { %1573 = vst [vmem:[%s393_s12] sm:$0xff] %v1847_v51  ;;  %v1848_v53 = vpack.c.bf16 %v1560_v52, %v1559_v50 }
 0x20c   : > { %1574 = vst [vmem:[%s393_s12 + $0x8] sm:$0xff] %v1848_v53 }
 0x211   : > { %v1617_v54 = vld [vmem:[%s393_s12] sm:$0xff] }
 0x212   : > { %1618 = vst [vmem:[%s1587_s0] sm:$0xff] %v1617_v54 }
 0x213   : > { %v1619_v56 = vld [vmem:[%s393_s12 + $0x8] sm:$0xff] }
 0x214   : > { %1620 = vst [vmem:[%s1587_s0 + $0x10] sm:$0xff] %v1619_v56 }
 0x215 PF: > { %s28_s17 = sadd.s32 1, %s2065_s17   ;;  %s2528_s1 = smov %s2053_s14 }
 0x216   : > { %p25_p6 = scmp.ge.s32.totalorder %s28_s17, 4   ;;  %s2529_s14 = smov %s2162_s23 }
 0x217   : > { %s2530_s15 = smov %s2061_s16  ;;  %s2531_s16 = smov %s2533_s19 }
 0x218   :  { %27 = sbr.rel (!%p25_p6) target bundleno = 28 (0x1c), region = 135 }

</bundles_post_ra>
